<compile_context>
chip_gen: v7x
topology: tpu7x:2x2x1
jax: 0.10.0
libtpu: 0.0.40
codegen_flags: <defaults>
</compile_context>

<pallas_src>
import functools

import jax
import jax.numpy as jnp
from jax import lax
from jax.experimental import pallas as pl
from jax.experimental.pallas import tpu as pltpu

_HALO = 8            # halo rows fetched below each body tile (kernel_size <= 9)
_SUB_TH = 8          # row-chunk height = one sublane group
_MAX_TILE_ROWS = 64  # cap on the fully unrolled per-tile row count


def _round_up(x, m):
    return ((x + m - 1) // m) * m


def _vmem_budget():
    """Tile-chooser budget: ~3/8 of this generation's physical VMEM
    (~24 MiB on v7x's 64 MiB/TC, ~48 MiB on v5e/v6e's 128 MiB)."""
    try:
        cap = int(pltpu.get_tpu_info().vmem_capacity_bytes)
    except Exception:  # non-TPU backend / older jax: conservative default
        cap = 64 << 20
    return max(16 << 20, (cap * 3) // 8)


def _choose_row_tile(ho, w_in, wo_pad, cin, cout, itemsize, budget):
    """Output-row tile TH (multiple of 8).  Keeps >= 2 tiles whenever Ho > 8
    (so both v7x TensorCores have work even at N == 1) and keeps the
    double-buffered working set under the generation-aware budget."""
    th = _round_up(min(ho, _MAX_TILE_ROWS), _SUB_TH)
    if ho > _SUB_TH:
        th = min(th, _round_up(pl.cdiv(ho, 2), _SUB_TH))

    def working_set(t):
        body = cin * t * w_in * itemsize
        halo = cin * _HALO * w_in * itemsize
        outb = cout * t * wo_pad * itemsize
        return 2 * (body + halo) + 2 * outb  # double-buffered inputs/outputs

    while th > _SUB_TH and working_set(th) > budget:
        th -= _SUB_TH
    th = max(th, _SUB_TH)
    return th, working_set(th)


def _choose_col_chunk(wo_pad, cout):
    """Column-chunk width (multiple of 128) so the Cout live (8, sub_wo) f32
    accumulators plus the working rows stay inside the 64-vreg file."""
    lane_tiles = max(1, min(4, 16 // max(cout, 1)))
    return min(wo_pad, 128 * lane_tiles)


def _dw_pw_kernel(dw_ref, pw_ref, b_ref, xb_ref, xh_ref, o_ref, *, kh, kw, sub_wo):
    """One (batch, row-tile) grid step.

    dw_ref : SMEM (Cin*KH*KW,) f32   sparse depthwise taps (ci-major)
    pw_ref : SMEM (Cout*Cin,)  f32   pointwise 1x1 weights (co-major)
    b_ref  : SMEM (Cout,)      f32   pointwise bias (zeros when bias=False)
    xb_ref : VMEM (1, Cin, TH,   W_in)   body input rows of this tile
    xh_ref : VMEM (1, Cin, HALO, W_in)   next HALO input rows (below the tile)
    o_ref  : VMEM (1, Cout, TH, Wo_pad)  output tile, Wo_pad % 128 == 0

    All arithmetic happens in (8 x cw) register chunks: the depthwise partial
    sum of one input channel stays in vregs and is FMA'd straight into the
    Cout register accumulators -- no VMEM scratch, no reloads.
    """
    _, cin, th, _ = xb_ref.shape
    _, cout, _, wo_pad = o_ref.shape

    for r0 in range(0, th, _SUB_TH):               # row chunks of the tile
        last_chunk = r0 + _SUB_TH >= th
        for c0 in range(0, wo_pad, sub_wo):        # lane-dense column chunks
            cw = min(sub_wo, wo_pad - c0)
            cwk = cw + kw - 1                      # input columns this chunk reads
            ridx = lax.broadcasted_iota(jnp.int32, (_SUB_TH, cwk), 0)
            outs = [jnp.full((_SUB_TH, cw), b_ref[co], jnp.float32)
                    for co in range(cout)]

            for ci in range(cin):
                # Two aligned 8-row loads per channel, cast to f32 once.
                # `bot` is the next 8 body rows, or the halo block for the
                # last row chunk of the tile.
                top = xb_ref[0, ci, r0:r0 + _SUB_TH,
                             c0:c0 + cwk].astype(jnp.float32)
                if kh > 1:
                    if last_chunk:
                        bot = xh_ref[0, ci, 0:_SUB_TH,
                                     c0:c0 + cwk].astype(jnp.float32)
                    else:
                        bot = xb_ref[0, ci, r0 + _SUB_TH:r0 + 2 * _SUB_TH,
                                     c0:c0 + cwk].astype(jnp.float32)

                dw_acc = jnp.zeros((_SUB_TH, cw), jnp.float32)
                for i in range(kh):
                    if i == 0:
                        rows = top
                    else:
                        # rows[m] = input row (r0 + i + m): two sublane rolls
                        # (XLU) of the aligned slabs + one select, instead of a
                        # fresh misaligned load per tap row.
                        rows = jnp.where(
                            ridx < _SUB_TH - i,
                            pltpu.roll(top, _SUB_TH - i, axis=0),
                            pltpu.roll(bot, _SUB_TH - i, axis=0))
                    for j in range(kw):
                        tap = dw_ref[ci * kh * kw + i * kw + j]
                        dw_acc = dw_acc + rows[:, j:j + cw] * tap

                # Pointwise 1x1: FMA this channel's depthwise result into every
                # output-channel accumulator (VPU; the MXU would be ~idle at
                # these channel counts).
                for co in range(cout):
                    outs[co] = outs[co] + dw_acc * pw_ref[co * cin + ci]

            for co in range(cout):
                o_ref[0, co, r0:r0 + _SUB_TH, c0:c0 + cw] = (
                    outs[co].astype(o_ref.dtype))


@functools.partial(jax.jit, static_argnames=("stride", "padding"))
def depthwise_conv_forward(x_nchw, dw_w, pw_w, pw_b, *, stride=1, padding=0):
    """Forward pass of DepthWiseConv.  x_nchw: (N, Cin, H, W)."""
    assert stride == 1, "only stride=1 implemented"  # TODO(synk): strided path
    N, Cin, H, W = x_nchw.shape
    KH, KW = int(dw_w.shape[2]), int(dw_w.shape[3])
    Cout = int(pw_w.shape[0])
    assert KH - 1 <= _HALO, "kernel_size > 9 not supported"

    H_p = H + 2 * padding
    W_p = W + 2 * padding
    Ho = H_p - KH + 1
    Wo = W_p - KW + 1
    Wo_pad = _round_up(Wo, 128)       # lane-dense output stores
    W_in = Wo_pad + KW - 1            # every tap column slice stays in bounds

    # TODO(synk): fold both pads into the kernel (index clamp + mask) to avoid
    # the padded activation copy in HBM (matters most on v5e).
    if padding > 0 or W_in > W_p:
        x_nchw = jnp.pad(
            x_nchw,
            ((0, 0), (0, 0), (padding, padding),
             (padding, padding + (W_in - W_p))))

    itemsize = x_nchw.dtype.itemsize
    budget = _vmem_budget()
    TH, ws_bytes = _choose_row_tile(Ho, W_in, Wo_pad, Cin, Cout, itemsize, budget)
    # Halo-clamp safety (see halo_idx): both must hold so that mis-fetched halo
    # rows can only ever feed output rows >= Ho, which the partial-block store
    # clips.
    assert TH % _HALO == 0
    NT = pl.cdiv(Ho, TH)
    halo_blocks = pl.cdiv(H_p, _HALO)
    sub_wo = _choose_col_chunk(Wo_pad, Cout)

    # Small parameters live in SMEM and are read as scalars inside the kernel.
    dw = dw_w.reshape(-1).astype(jnp.float32)                        # (Cin*KH*KW,)
    pw = pw_w.reshape(-1).astype(jnp.float32)                        # (Cout*Cin,)
    b = (pw_b if pw_b is not None
         else jnp.zeros((Cout,), jnp.float32)).astype(jnp.float32)   # (Cout,)

    def body_idx(n, t):
        return (n, 0, t, 0)

    def halo_idx(n, t):
        # The HALO input rows right below this tile's body rows, clamped to the
        # last in-bounds 8-row block.  The clamp can only trigger when every
        # input row the *valid* output rows of this tile need is already inside
        # the body block (guaranteed by TH % _HALO == 0 and KH-1 <= _HALO,
        # asserted above); the mis-fetched rows feed only output rows >= Ho.
        return (n, 0, jnp.minimum((t + 1) * (TH // _HALO), halo_blocks - 1), 0)

    smem = pl.BlockSpec(memory_space=pltpu.MemorySpace.SMEM)

    flops = 2 * N * Ho * Wo * Cin * (KH * KW + Cout)
    bytes_accessed = (x_nchw.size * itemsize
                      + N * Cout * Ho * Wo_pad * itemsize
                      + (dw.size + pw.size + b.size) * 4)

    out_padded = pl.pallas_call(
        functools.partial(_dw_pw_kernel, kh=KH, kw=KW, sub_wo=sub_wo),
        out_shape=jax.ShapeDtypeStruct((N, Cout, Ho, Wo_pad), x_nchw.dtype),
        grid=(N, NT),
        in_specs=[
            smem,                                           # depthwise taps
            smem,                                           # pointwise weights
            smem,                                           # bias
            pl.BlockSpec((1, Cin, TH, W_in), body_idx),     # body rows
            pl.BlockSpec((1, Cin, _HALO, W_in), halo_idx),  # halo rows
        ],
        out_specs=pl.BlockSpec((1, Cout, TH, Wo_pad), body_idx),
        compiler_params=pltpu.CompilerParams(
            # No reduction axis: every (n, row-tile) writes its own output
            # block, so both grid axes can be sharded across cores.
            dimension_semantics=("parallel", "parallel"),
            # ws_bytes already accounts for the double buffering; add a small
            # margin only (stays well clear of v7x's 64 MiB physical VMEM).
            vmem_limit_bytes=int(min(max(ws_bytes + (4 << 20), 16 << 20),
                                     48 << 20)),
        ),
        cost_estimate=pl.CostEstimate(
            flops=flops, transcendentals=0, bytes_accessed=bytes_accessed),
    )(dw, pw, b, x_nchw, x_nchw)

    return out_padded[..., :Wo]


def init_params(key, in_channels, out_channels, kernel_size, sparsity=0.2,
                bias=False):
    """Deterministic synthetic init matching the module's parameter shapes."""
    kh = kw = kernel_size
    k_dw, k_pw, k_b, k_mask = jax.random.split(key, 4)

    # Depthwise weight (Cin, 1, KH, KW), uniform like PyTorch's default init.
    bound_dw = 1.0 / (kh * kw) ** 0.5
    dw_w = jax.random.uniform(k_dw, (in_channels, 1, kh, kw), jnp.float32,
                              minval=-bound_dw, maxval=bound_dw)

    # Per-channel sparsity mask: keep round((1-sparsity)*KH*KW) taps per channel.
    size = kh * kw
    num_nz = int(round((1.0 - sparsity) * size))
    masks = []
    mkey = k_mask
    for _ in range(in_channels):
        mkey, sub = jax.random.split(mkey)
        perm = jax.random.permutation(sub, size)
        m = jnp.zeros((size,), jnp.bool_).at[perm[:num_nz]].set(True)
        masks.append(m)
    mask = jnp.stack(masks).reshape(in_channels, 1, kh, kw)
    dw_w = dw_w * mask.astype(dw_w.dtype)

    # Pointwise weight (Cout, Cin, 1, 1).
    bound_pw = 1.0 / in_channels ** 0.5
    pw_w = jax.random.uniform(k_pw, (out_channels, in_channels, 1, 1),
                              jnp.float32, minval=-bound_pw, maxval=bound_pw)
    pw_b = (jax.random.uniform(k_b, (out_channels,), jnp.float32,
                               minval=-bound_pw, maxval=bound_pw)
            if bias else None)
    return dw_w, pw_w, pw_b


def reference_forward(x_nchw, dw_w, pw_w, pw_b, stride=1, padding=0):
    y = jax.lax.conv_general_dilated(
        x_nchw, dw_w, window_strides=(stride, stride),
        padding=[(padding, padding), (padding, padding)],
        dimension_numbers=("NCHW", "OIHW", "NCHW"),
        feature_group_count=x_nchw.shape[1])
    z = jax.lax.conv_general_dilated(
        y, pw_w, window_strides=(1, 1), padding="VALID",
        dimension_numbers=("NCHW", "OIHW", "NCHW"))
    if pw_b is not None:
        z = z + pw_b[None, :, None, None]
    return z


if __name__ == "__main__":
    key = jax.random.PRNGKey(0)
    kx, kp = jax.random.split(key)

    N, Cin, Cout, H, W, K = 2, 4, 8, 16, 16, 3
    x = jax.random.normal(kx, (N, Cin, H, W), jnp.float32)
    dw_w, pw_w, pw_b = init_params(kp, Cin, Cout, K, sparsity=0.2, bias=False)

    out = depthwise_conv_forward(x, dw_w, pw_w, pw_b, stride=1, padding=0)
    out = jax.block_until_ready(out)

    ref = reference_forward(x, dw_w, pw_w, pw_b, stride=1, padding=0)
    assert out.shape == (N, Cout, H - K + 1, W - K + 1), out.shape
    assert jnp.allclose(out, ref, atol=1e-4, rtol=1e-4), \
        float(jnp.max(jnp.abs(out - ref)))

    print("KERNEL_OK")
</pallas_src>

<mosaic_0001>
module attributes {stable_mosaic.version = 11 : i64} {
  func.func @_dw_pw_kernel(%arg0: i32, %arg1: i32, %arg2: memref<36xf32, #tpu.memory_space<smem>>, %arg3: memref<32xf32, #tpu.memory_space<smem>>, %arg4: memref<8xf32, #tpu.memory_space<smem>>, %arg5: memref<1x4x8x130xf32, #tpu.memory_space<vmem>>, %arg6: memref<1x4x8x130xf32, #tpu.memory_space<vmem>>, %arg7: memref<1x8x8x128xf32, #tpu.memory_space<vmem>>) attributes {dimension_semantics = [#tpu.dimension_semantics<parallel>, #tpu.dimension_semantics<parallel>], iteration_bounds = array<i64: 2, 2>, scalar_prefetch = 0 : i64, scratch_operands = 0 : i64, tpu.core_type = #tpu.core_type<tc>, window_params = [{transform_indices = @transform_0, window_bounds = array<i64: 36>}, {transform_indices = @transform_1, window_bounds = array<i64: 32>}, {transform_indices = @transform_2, window_bounds = array<i64: 8>}, {transform_indices = @transform_3, window_bounds = array<i64: 1, 4, 8, 130>}, {transform_indices = @transform_4, window_bounds = array<i64: 1, 4, 8, 130>}, {transform_indices = @transform_5, window_bounds = array<i64: 1, 8, 8, 128>}]} {
    %0 = tpu.iota {dimensions = array<i32: 0>} : vector<8x130xi32>
    %c0 = arith.constant 0 : index
    %1 = memref.load %arg4[%c0] : memref<8xf32, #tpu.memory_space<smem>>
    %2 = vector.broadcast %1 : f32 to vector<8x128xf32>
    %c1 = arith.constant 1 : index
    %3 = memref.load %arg4[%c1] : memref<8xf32, #tpu.memory_space<smem>>
    %4 = vector.broadcast %3 : f32 to vector<8x128xf32>
    %c2 = arith.constant 2 : index
    %5 = memref.load %arg4[%c2] : memref<8xf32, #tpu.memory_space<smem>>
    %6 = vector.broadcast %5 : f32 to vector<8x128xf32>
    %c3 = arith.constant 3 : index
    %7 = memref.load %arg4[%c3] : memref<8xf32, #tpu.memory_space<smem>>
    %8 = vector.broadcast %7 : f32 to vector<8x128xf32>
    %c4 = arith.constant 4 : index
    %9 = memref.load %arg4[%c4] : memref<8xf32, #tpu.memory_space<smem>>
    %10 = vector.broadcast %9 : f32 to vector<8x128xf32>
    %c5 = arith.constant 5 : index
    %11 = memref.load %arg4[%c5] : memref<8xf32, #tpu.memory_space<smem>>
    %12 = vector.broadcast %11 : f32 to vector<8x128xf32>
    %c6 = arith.constant 6 : index
    %13 = memref.load %arg4[%c6] : memref<8xf32, #tpu.memory_space<smem>>
    %14 = vector.broadcast %13 : f32 to vector<8x128xf32>
    %c7 = arith.constant 7 : index
    %15 = memref.load %arg4[%c7] : memref<8xf32, #tpu.memory_space<smem>>
    %16 = vector.broadcast %15 : f32 to vector<8x128xf32>
    %c0_0 = arith.constant 0 : index
    %c0_1 = arith.constant 0 : index
    %c0_2 = arith.constant 0 : index
    %c0_3 = arith.constant 0 : index
    %17 = vector.load %arg5[%c0_0, %c0_1, %c0_2, %c0_3] : memref<1x4x8x130xf32, #tpu.memory_space<vmem>>, vector<1x1x8x130xf32>
    %18 = vector.shape_cast %17 : vector<1x1x8x130xf32> to vector<8x130xf32>
    %c0_4 = arith.constant 0 : index
    %c0_5 = arith.constant 0 : index
    %c0_6 = arith.constant 0 : index
    %c0_7 = arith.constant 0 : index
    %19 = vector.load %arg6[%c0_4, %c0_5, %c0_6, %c0_7] : memref<1x4x8x130xf32, #tpu.memory_space<vmem>>, vector<1x1x8x130xf32>
    %20 = vector.shape_cast %19 : vector<1x1x8x130xf32> to vector<8x130xf32>
    %cst = arith.constant 0.000000e+00 : f32
    %21 = vector.broadcast %cst : f32 to vector<8x128xf32>
    %c0_8 = arith.constant 0 : index
    %22 = memref.load %arg2[%c0_8] : memref<36xf32, #tpu.memory_space<smem>>
    %23 = vector.extract_strided_slice %18 {offsets = [0, 0], sizes = [8, 128], strides = [1, 1]} : vector<8x130xf32> to vector<8x128xf32>
    %24 = vector.broadcast %22 : f32 to vector<8x128xf32>
    %25 = arith.mulf %23, %24 : vector<8x128xf32>
    %26 = arith.addf %21, %25 : vector<8x128xf32>
    %c1_9 = arith.constant 1 : index
    %27 = memref.load %arg2[%c1_9] : memref<36xf32, #tpu.memory_space<smem>>
    %28 = vector.extract_strided_slice %18 {offsets = [0, 1], sizes = [8, 128], strides = [1, 1]} : vector<8x130xf32> to vector<8x128xf32>
    %29 = vector.broadcast %27 : f32 to vector<8x128xf32>
    %30 = arith.mulf %28, %29 : vector<8x128xf32>
    %31 = arith.addf %26, %30 : vector<8x128xf32>
    %c2_10 = arith.constant 2 : index
    %32 = memref.load %arg2[%c2_10] : memref<36xf32, #tpu.memory_space<smem>>
    %33 = vector.extract_strided_slice %18 {offsets = [0, 2], sizes = [8, 128], strides = [1, 1]} : vector<8x130xf32> to vector<8x128xf32>
    %34 = vector.broadcast %32 : f32 to vector<8x128xf32>
    %35 = arith.mulf %33, %34 : vector<8x128xf32>
    %36 = arith.addf %31, %35 : vector<8x128xf32>
    %c7_i32 = arith.constant 7 : i32
    %37 = vector.broadcast %c7_i32 : i32 to vector<8x130xi32>
    %38 = arith.cmpi slt, %0, %37 : vector<8x130xi32>
    %c7_i32_11 = arith.constant 7 : i32
    %39 = tpu.dynamic_rotate %18 by %c7_i32_11 dim 0 : vector<8x130xf32>, i32 -> vector<8x130xf32>
    %c7_i32_12 = arith.constant 7 : i32
    %40 = tpu.dynamic_rotate %20 by %c7_i32_12 dim 0 : vector<8x130xf32>, i32 -> vector<8x130xf32>
    %41 = arith.select %38, %39, %40 : vector<8x130xi1>, vector<8x130xf32>
    %c3_13 = arith.constant 3 : index
    %42 = memref.load %arg2[%c3_13] : memref<36xf32, #tpu.memory_space<smem>>
    %43 = vector.extract_strided_slice %41 {offsets = [0, 0], sizes = [8, 128], strides = [1, 1]} : vector<8x130xf32> to vector<8x128xf32>
    %44 = vector.broadcast %42 : f32 to vector<8x128xf32>
    %45 = arith.mulf %43, %44 : vector<8x128xf32>
    %46 = arith.addf %36, %45 : vector<8x128xf32>
    %c4_14 = arith.constant 4 : index
    %47 = memref.load %arg2[%c4_14] : memref<36xf32, #tpu.memory_space<smem>>
    %48 = vector.extract_strided_slice %41 {offsets = [0, 1], sizes = [8, 128], strides = [1, 1]} : vector<8x130xf32> to vector<8x128xf32>
    %49 = vector.broadcast %47 : f32 to vector<8x128xf32>
    %50 = arith.mulf %48, %49 : vector<8x128xf32>
    %51 = arith.addf %46, %50 : vector<8x128xf32>
    %c5_15 = arith.constant 5 : index
    %52 = memref.load %arg2[%c5_15] : memref<36xf32, #tpu.memory_space<smem>>
    %53 = vector.extract_strided_slice %41 {offsets = [0, 2], sizes = [8, 128], strides = [1, 1]} : vector<8x130xf32> to vector<8x128xf32>
    %54 = vector.broadcast %52 : f32 to vector<8x128xf32>
    %55 = arith.mulf %53, %54 : vector<8x128xf32>
    %56 = arith.addf %51, %55 : vector<8x128xf32>
    %c6_i32 = arith.constant 6 : i32
    %57 = vector.broadcast %c6_i32 : i32 to vector<8x130xi32>
    %58 = arith.cmpi slt, %0, %57 : vector<8x130xi32>
    %c6_i32_16 = arith.constant 6 : i32
    %59 = tpu.dynamic_rotate %18 by %c6_i32_16 dim 0 : vector<8x130xf32>, i32 -> vector<8x130xf32>
    %c6_i32_17 = arith.constant 6 : i32
    %60 = tpu.dynamic_rotate %20 by %c6_i32_17 dim 0 : vector<8x130xf32>, i32 -> vector<8x130xf32>
    %61 = arith.select %58, %59, %60 : vector<8x130xi1>, vector<8x130xf32>
    %c6_18 = arith.constant 6 : index
    %62 = memref.load %arg2[%c6_18] : memref<36xf32, #tpu.memory_space<smem>>
    %63 = vector.extract_strided_slice %61 {offsets = [0, 0], sizes = [8, 128], strides = [1, 1]} : vector<8x130xf32> to vector<8x128xf32>
    %64 = vector.broadcast %62 : f32 to vector<8x128xf32>
    %65 = arith.mulf %63, %64 : vector<8x128xf32>
    %66 = arith.addf %56, %65 : vector<8x128xf32>
    %c7_19 = arith.constant 7 : index
    %67 = memref.load %arg2[%c7_19] : memref<36xf32, #tpu.memory_space<smem>>
    %68 = vector.extract_strided_slice %61 {offsets = [0, 1], sizes = [8, 128], strides = [1, 1]} : vector<8x130xf32> to vector<8x128xf32>
    %69 = vector.broadcast %67 : f32 to vector<8x128xf32>
    %70 = arith.mulf %68, %69 : vector<8x128xf32>
    %71 = arith.addf %66, %70 : vector<8x128xf32>
    %c8 = arith.constant 8 : index
    %72 = memref.load %arg2[%c8] : memref<36xf32, #tpu.memory_space<smem>>
    %73 = vector.extract_strided_slice %61 {offsets = [0, 2], sizes = [8, 128], strides = [1, 1]} : vector<8x130xf32> to vector<8x128xf32>
    %74 = vector.broadcast %72 : f32 to vector<8x128xf32>
    %75 = arith.mulf %73, %74 : vector<8x128xf32>
    %76 = arith.addf %71, %75 : vector<8x128xf32>
    %c0_20 = arith.constant 0 : index
    %77 = memref.load %arg3[%c0_20] : memref<32xf32, #tpu.memory_space<smem>>
    %78 = vector.broadcast %77 : f32 to vector<8x128xf32>
    %79 = arith.mulf %76, %78 : vector<8x128xf32>
    %80 = arith.addf %2, %79 : vector<8x128xf32>
    %c4_21 = arith.constant 4 : index
    %81 = memref.load %arg3[%c4_21] : memref<32xf32, #tpu.memory_space<smem>>
    %82 = vector.broadcast %81 : f32 to vector<8x128xf32>
    %83 = arith.mulf %76, %82 : vector<8x128xf32>
    %84 = arith.addf %4, %83 : vector<8x128xf32>
    %c8_22 = arith.constant 8 : index
    %85 = memref.load %arg3[%c8_22] : memref<32xf32, #tpu.memory_space<smem>>
    %86 = vector.broadcast %85 : f32 to vector<8x128xf32>
    %87 = arith.mulf %76, %86 : vector<8x128xf32>
    %88 = arith.addf %6, %87 : vector<8x128xf32>
    %c12 = arith.constant 12 : index
    %89 = memref.load %arg3[%c12] : memref<32xf32, #tpu.memory_space<smem>>
    %90 = vector.broadcast %89 : f32 to vector<8x128xf32>
    %91 = arith.mulf %76, %90 : vector<8x128xf32>
    %92 = arith.addf %8, %91 : vector<8x128xf32>
    %c16 = arith.constant 16 : index
    %93 = memref.load %arg3[%c16] : memref<32xf32, #tpu.memory_space<smem>>
    %94 = vector.broadcast %93 : f32 to vector<8x128xf32>
    %95 = arith.mulf %76, %94 : vector<8x128xf32>
    %96 = arith.addf %10, %95 : vector<8x128xf32>
    %c20 = arith.constant 20 : index
    %97 = memref.load %arg3[%c20] : memref<32xf32, #tpu.memory_space<smem>>
    %98 = vector.broadcast %97 : f32 to vector<8x128xf32>
    %99 = arith.mulf %76, %98 : vector<8x128xf32>
    %100 = arith.addf %12, %99 : vector<8x128xf32>
    %c24 = arith.constant 24 : index
    %101 = memref.load %arg3[%c24] : memref<32xf32, #tpu.memory_space<smem>>
    %102 = vector.broadcast %101 : f32 to vector<8x128xf32>
    %103 = arith.mulf %76, %102 : vector<8x128xf32>
    %104 = arith.addf %14, %103 : vector<8x128xf32>
    %c28 = arith.constant 28 : index
    %105 = memref.load %arg3[%c28] : memref<32xf32, #tpu.memory_space<smem>>
    %106 = vector.broadcast %105 : f32 to vector<8x128xf32>
    %107 = arith.mulf %76, %106 : vector<8x128xf32>
    %108 = arith.addf %16, %107 : vector<8x128xf32>
    %c0_23 = arith.constant 0 : index
    %c1_24 = arith.constant 1 : index
    %c0_25 = arith.constant 0 : index
    %c0_26 = arith.constant 0 : index
    %109 = vector.load %arg5[%c0_23, %c1_24, %c0_25, %c0_26] : memref<1x4x8x130xf32, #tpu.memory_space<vmem>>, vector<1x1x8x130xf32>
    %110 = vector.shape_cast %109 : vector<1x1x8x130xf32> to vector<8x130xf32>
    %c0_27 = arith.constant 0 : index
    %c1_28 = arith.constant 1 : index
    %c0_29 = arith.constant 0 : index
    %c0_30 = arith.constant 0 : index
    %111 = vector.load %arg6[%c0_27, %c1_28, %c0_29, %c0_30] : memref<1x4x8x130xf32, #tpu.memory_space<vmem>>, vector<1x1x8x130xf32>
    %112 = vector.shape_cast %111 : vector<1x1x8x130xf32> to vector<8x130xf32>
    %cst_31 = arith.constant 0.000000e+00 : f32
    %113 = vector.broadcast %cst_31 : f32 to vector<8x128xf32>
    %c9 = arith.constant 9 : index
    %114 = memref.load %arg2[%c9] : memref<36xf32, #tpu.memory_space<smem>>
    %115 = vector.extract_strided_slice %110 {offsets = [0, 0], sizes = [8, 128], strides = [1, 1]} : vector<8x130xf32> to vector<8x128xf32>
    %116 = vector.broadcast %114 : f32 to vector<8x128xf32>
    %117 = arith.mulf %115, %116 : vector<8x128xf32>
    %118 = arith.addf %113, %117 : vector<8x128xf32>
    %c10 = arith.constant 10 : index
    %119 = memref.load %arg2[%c10] : memref<36xf32, #tpu.memory_space<smem>>
    %120 = vector.extract_strided_slice %110 {offsets = [0, 1], sizes = [8, 128], strides = [1, 1]} : vector<8x130xf32> to vector<8x128xf32>
    %121 = vector.broadcast %119 : f32 to vector<8x128xf32>
    %122 = arith.mulf %120, %121 : vector<8x128xf32>
    %123 = arith.addf %118, %122 : vector<8x128xf32>
    %c11 = arith.constant 11 : index
    %124 = memref.load %arg2[%c11] : memref<36xf32, #tpu.memory_space<smem>>
    %125 = vector.extract_strided_slice %110 {offsets = [0, 2], sizes = [8, 128], strides = [1, 1]} : vector<8x130xf32> to vector<8x128xf32>
    %126 = vector.broadcast %124 : f32 to vector<8x128xf32>
    %127 = arith.mulf %125, %126 : vector<8x128xf32>
    %128 = arith.addf %123, %127 : vector<8x128xf32>
    %c7_i32_32 = arith.constant 7 : i32
    %129 = vector.broadcast %c7_i32_32 : i32 to vector<8x130xi32>
    %130 = arith.cmpi slt, %0, %129 : vector<8x130xi32>
    %c7_i32_33 = arith.constant 7 : i32
    %131 = tpu.dynamic_rotate %110 by %c7_i32_33 dim 0 : vector<8x130xf32>, i32 -> vector<8x130xf32>
    %c7_i32_34 = arith.constant 7 : i32
    %132 = tpu.dynamic_rotate %112 by %c7_i32_34 dim 0 : vector<8x130xf32>, i32 -> vector<8x130xf32>
    %133 = arith.select %130, %131, %132 : vector<8x130xi1>, vector<8x130xf32>
    %c12_35 = arith.constant 12 : index
    %134 = memref.load %arg2[%c12_35] : memref<36xf32, #tpu.memory_space<smem>>
    %135 = vector.extract_strided_slice %133 {offsets = [0, 0], sizes = [8, 128], strides = [1, 1]} : vector<8x130xf32> to vector<8x128xf32>
    %136 = vector.broadcast %134 : f32 to vector<8x128xf32>
    %137 = arith.mulf %135, %136 : vector<8x128xf32>
    %138 = arith.addf %128, %137 : vector<8x128xf32>
    %c13 = arith.constant 13 : index
    %139 = memref.load %arg2[%c13] : memref<36xf32, #tpu.memory_space<smem>>
    %140 = vector.extract_strided_slice %133 {offsets = [0, 1], sizes = [8, 128], strides = [1, 1]} : vector<8x130xf32> to vector<8x128xf32>
    %141 = vector.broadcast %139 : f32 to vector<8x128xf32>
    %142 = arith.mulf %140, %141 : vector<8x128xf32>
    %143 = arith.addf %138, %142 : vector<8x128xf32>
    %c14 = arith.constant 14 : index
    %144 = memref.load %arg2[%c14] : memref<36xf32, #tpu.memory_space<smem>>
    %145 = vector.extract_strided_slice %133 {offsets = [0, 2], sizes = [8, 128], strides = [1, 1]} : vector<8x130xf32> to vector<8x128xf32>
    %146 = vector.broadcast %144 : f32 to vector<8x128xf32>
    %147 = arith.mulf %145, %146 : vector<8x128xf32>
    %148 = arith.addf %143, %147 : vector<8x128xf32>
    %c6_i32_36 = arith.constant 6 : i32
    %149 = vector.broadcast %c6_i32_36 : i32 to vector<8x130xi32>
    %150 = arith.cmpi slt, %0, %149 : vector<8x130xi32>
    %c6_i32_37 = arith.constant 6 : i32
    %151 = tpu.dynamic_rotate %110 by %c6_i32_37 dim 0 : vector<8x130xf32>, i32 -> vector<8x130xf32>
    %c6_i32_38 = arith.constant 6 : i32
    %152 = tpu.dynamic_rotate %112 by %c6_i32_38 dim 0 : vector<8x130xf32>, i32 -> vector<8x130xf32>
    %153 = arith.select %150, %151, %152 : vector<8x130xi1>, vector<8x130xf32>
    %c15 = arith.constant 15 : index
    %154 = memref.load %arg2[%c15] : memref<36xf32, #tpu.memory_space<smem>>
    %155 = vector.extract_strided_slice %153 {offsets = [0, 0], sizes = [8, 128], strides = [1, 1]} : vector<8x130xf32> to vector<8x128xf32>
    %156 = vector.broadcast %154 : f32 to vector<8x128xf32>
    %157 = arith.mulf %155, %156 : vector<8x128xf32>
    %158 = arith.addf %148, %157 : vector<8x128xf32>
    %c16_39 = arith.constant 16 : index
    %159 = memref.load %arg2[%c16_39] : memref<36xf32, #tpu.memory_space<smem>>
    %160 = vector.extract_strided_slice %153 {offsets = [0, 1], sizes = [8, 128], strides = [1, 1]} : vector<8x130xf32> to vector<8x128xf32>
    %161 = vector.broadcast %159 : f32 to vector<8x128xf32>
    %162 = arith.mulf %160, %161 : vector<8x128xf32>
    %163 = arith.addf %158, %162 : vector<8x128xf32>
    %c17 = arith.constant 17 : index
    %164 = memref.load %arg2[%c17] : memref<36xf32, #tpu.memory_space<smem>>
    %165 = vector.extract_strided_slice %153 {offsets = [0, 2], sizes = [8, 128], strides = [1, 1]} : vector<8x130xf32> to vector<8x128xf32>
    %166 = vector.broadcast %164 : f32 to vector<8x128xf32>
    %167 = arith.mulf %165, %166 : vector<8x128xf32>
    %168 = arith.addf %163, %167 : vector<8x128xf32>
    %c1_40 = arith.constant 1 : index
    %169 = memref.load %arg3[%c1_40] : memref<32xf32, #tpu.memory_space<smem>>
    %170 = vector.broadcast %169 : f32 to vector<8x128xf32>
    %171 = arith.mulf %168, %170 : vector<8x128xf32>
    %172 = arith.addf %80, %171 : vector<8x128xf32>
    %c5_41 = arith.constant 5 : index
    %173 = memref.load %arg3[%c5_41] : memref<32xf32, #tpu.memory_space<smem>>
    %174 = vector.broadcast %173 : f32 to vector<8x128xf32>
    %175 = arith.mulf %168, %174 : vector<8x128xf32>
    %176 = arith.addf %84, %175 : vector<8x128xf32>
    %c9_42 = arith.constant 9 : index
    %177 = memref.load %arg3[%c9_42] : memref<32xf32, #tpu.memory_space<smem>>
    %178 = vector.broadcast %177 : f32 to vector<8x128xf32>
    %179 = arith.mulf %168, %178 : vector<8x128xf32>
    %180 = arith.addf %88, %179 : vector<8x128xf32>
    %c13_43 = arith.constant 13 : index
    %181 = memref.load %arg3[%c13_43] : memref<32xf32, #tpu.memory_space<smem>>
    %182 = vector.broadcast %181 : f32 to vector<8x128xf32>
    %183 = arith.mulf %168, %182 : vector<8x128xf32>
    %184 = arith.addf %92, %183 : vector<8x128xf32>
    %c17_44 = arith.constant 17 : index
    %185 = memref.load %arg3[%c17_44] : memref<32xf32, #tpu.memory_space<smem>>
    %186 = vector.broadcast %185 : f32 to vector<8x128xf32>
    %187 = arith.mulf %168, %186 : vector<8x128xf32>
    %188 = arith.addf %96, %187 : vector<8x128xf32>
    %c21 = arith.constant 21 : index
    %189 = memref.load %arg3[%c21] : memref<32xf32, #tpu.memory_space<smem>>
    %190 = vector.broadcast %189 : f32 to vector<8x128xf32>
    %191 = arith.mulf %168, %190 : vector<8x128xf32>
    %192 = arith.addf %100, %191 : vector<8x128xf32>
    %c25 = arith.constant 25 : index
    %193 = memref.load %arg3[%c25] : memref<32xf32, #tpu.memory_space<smem>>
    %194 = vector.broadcast %193 : f32 to vector<8x128xf32>
    %195 = arith.mulf %168, %194 : vector<8x128xf32>
    %196 = arith.addf %104, %195 : vector<8x128xf32>
    %c29 = arith.constant 29 : index
    %197 = memref.load %arg3[%c29] : memref<32xf32, #tpu.memory_space<smem>>
    %198 = vector.broadcast %197 : f32 to vector<8x128xf32>
    %199 = arith.mulf %168, %198 : vector<8x128xf32>
    %200 = arith.addf %108, %199 : vector<8x128xf32>
    %c0_45 = arith.constant 0 : index
    %c2_46 = arith.constant 2 : index
    %c0_47 = arith.constant 0 : index
    %c0_48 = arith.constant 0 : index
    %201 = vector.load %arg5[%c0_45, %c2_46, %c0_47, %c0_48] : memref<1x4x8x130xf32, #tpu.memory_space<vmem>>, vector<1x1x8x130xf32>
    %202 = vector.shape_cast %201 : vector<1x1x8x130xf32> to vector<8x130xf32>
    %c0_49 = arith.constant 0 : index
    %c2_50 = arith.constant 2 : index
    %c0_51 = arith.constant 0 : index
    %c0_52 = arith.constant 0 : index
    %203 = vector.load %arg6[%c0_49, %c2_50, %c0_51, %c0_52] : memref<1x4x8x130xf32, #tpu.memory_space<vmem>>, vector<1x1x8x130xf32>
    %204 = vector.shape_cast %203 : vector<1x1x8x130xf32> to vector<8x130xf32>
    %cst_53 = arith.constant 0.000000e+00 : f32
    %205 = vector.broadcast %cst_53 : f32 to vector<8x128xf32>
    %c18 = arith.constant 18 : index
    %206 = memref.load %arg2[%c18] : memref<36xf32, #tpu.memory_space<smem>>
    %207 = vector.extract_strided_slice %202 {offsets = [0, 0], sizes = [8, 128], strides = [1, 1]} : vector<8x130xf32> to vector<8x128xf32>
    %208 = vector.broadcast %206 : f32 to vector<8x128xf32>
    %209 = arith.mulf %207, %208 : vector<8x128xf32>
    %210 = arith.addf %205, %209 : vector<8x128xf32>
    %c19 = arith.constant 19 : index
    %211 = memref.load %arg2[%c19] : memref<36xf32, #tpu.memory_space<smem>>
    %212 = vector.extract_strided_slice %202 {offsets = [0, 1], sizes = [8, 128], strides = [1, 1]} : vector<8x130xf32> to vector<8x128xf32>
    %213 = vector.broadcast %211 : f32 to vector<8x128xf32>
    %214 = arith.mulf %212, %213 : vector<8x128xf32>
    %215 = arith.addf %210, %214 : vector<8x128xf32>
    %c20_54 = arith.constant 20 : index
    %216 = memref.load %arg2[%c20_54] : memref<36xf32, #tpu.memory_space<smem>>
    %217 = vector.extract_strided_slice %202 {offsets = [0, 2], sizes = [8, 128], strides = [1, 1]} : vector<8x130xf32> to vector<8x128xf32>
    %218 = vector.broadcast %216 : f32 to vector<8x128xf32>
    %219 = arith.mulf %217, %218 : vector<8x128xf32>
    %220 = arith.addf %215, %219 : vector<8x128xf32>
    %c7_i32_55 = arith.constant 7 : i32
    %221 = vector.broadcast %c7_i32_55 : i32 to vector<8x130xi32>
    %222 = arith.cmpi slt, %0, %221 : vector<8x130xi32>
    %c7_i32_56 = arith.constant 7 : i32
    %223 = tpu.dynamic_rotate %202 by %c7_i32_56 dim 0 : vector<8x130xf32>, i32 -> vector<8x130xf32>
    %c7_i32_57 = arith.constant 7 : i32
    %224 = tpu.dynamic_rotate %204 by %c7_i32_57 dim 0 : vector<8x130xf32>, i32 -> vector<8x130xf32>
    %225 = arith.select %222, %223, %224 : vector<8x130xi1>, vector<8x130xf32>
    %c21_58 = arith.constant 21 : index
    %226 = memref.load %arg2[%c21_58] : memref<36xf32, #tpu.memory_space<smem>>
    %227 = vector.extract_strided_slice %225 {offsets = [0, 0], sizes = [8, 128], strides = [1, 1]} : vector<8x130xf32> to vector<8x128xf32>
    %228 = vector.broadcast %226 : f32 to vector<8x128xf32>
    %229 = arith.mulf %227, %228 : vector<8x128xf32>
    %230 = arith.addf %220, %229 : vector<8x128xf32>
    %c22 = arith.constant 22 : index
    %231 = memref.load %arg2[%c22] : memref<36xf32, #tpu.memory_space<smem>>
    %232 = vector.extract_strided_slice %225 {offsets = [0, 1], sizes = [8, 128], strides = [1, 1]} : vector<8x130xf32> to vector<8x128xf32>
    %233 = vector.broadcast %231 : f32 to vector<8x128xf32>
    %234 = arith.mulf %232, %233 : vector<8x128xf32>
    %235 = arith.addf %230, %234 : vector<8x128xf32>
    %c23 = arith.constant 23 : index
    %236 = memref.load %arg2[%c23] : memref<36xf32, #tpu.memory_space<smem>>
    %237 = vector.extract_strided_slice %225 {offsets = [0, 2], sizes = [8, 128], strides = [1, 1]} : vector<8x130xf32> to vector<8x128xf32>
    %238 = vector.broadcast %236 : f32 to vector<8x128xf32>
    %239 = arith.mulf %237, %238 : vector<8x128xf32>
    %240 = arith.addf %235, %239 : vector<8x128xf32>
    %c6_i32_59 = arith.constant 6 : i32
    %241 = vector.broadcast %c6_i32_59 : i32 to vector<8x130xi32>
    %242 = arith.cmpi slt, %0, %241 : vector<8x130xi32>
    %c6_i32_60 = arith.constant 6 : i32
    %243 = tpu.dynamic_rotate %202 by %c6_i32_60 dim 0 : vector<8x130xf32>, i32 -> vector<8x130xf32>
    %c6_i32_61 = arith.constant 6 : i32
    %244 = tpu.dynamic_rotate %204 by %c6_i32_61 dim 0 : vector<8x130xf32>, i32 -> vector<8x130xf32>
    %245 = arith.select %242, %243, %244 : vector<8x130xi1>, vector<8x130xf32>
    %c24_62 = arith.constant 24 : index
    %246 = memref.load %arg2[%c24_62] : memref<36xf32, #tpu.memory_space<smem>>
    %247 = vector.extract_strided_slice %245 {offsets = [0, 0], sizes = [8, 128], strides = [1, 1]} : vector<8x130xf32> to vector<8x128xf32>
    %248 = vector.broadcast %246 : f32 to vector<8x128xf32>
    %249 = arith.mulf %247, %248 : vector<8x128xf32>
    %250 = arith.addf %240, %249 : vector<8x128xf32>
    %c25_63 = arith.constant 25 : index
    %251 = memref.load %arg2[%c25_63] : memref<36xf32, #tpu.memory_space<smem>>
    %252 = vector.extract_strided_slice %245 {offsets = [0, 1], sizes = [8, 128], strides = [1, 1]} : vector<8x130xf32> to vector<8x128xf32>
    %253 = vector.broadcast %251 : f32 to vector<8x128xf32>
    %254 = arith.mulf %252, %253 : vector<8x128xf32>
    %255 = arith.addf %250, %254 : vector<8x128xf32>
    %c26 = arith.constant 26 : index
    %256 = memref.load %arg2[%c26] : memref<36xf32, #tpu.memory_space<smem>>
    %257 = vector.extract_strided_slice %245 {offsets = [0, 2], sizes = [8, 128], strides = [1, 1]} : vector<8x130xf32> to vector<8x128xf32>
    %258 = vector.broadcast %256 : f32 to vector<8x128xf32>
    %259 = arith.mulf %257, %258 : vector<8x128xf32>
    %260 = arith.addf %255, %259 : vector<8x128xf32>
    %c2_64 = arith.constant 2 : index
    %261 = memref.load %arg3[%c2_64] : memref<32xf32, #tpu.memory_space<smem>>
    %262 = vector.broadcast %261 : f32 to vector<8x128xf32>
    %263 = arith.mulf %260, %262 : vector<8x128xf32>
    %264 = arith.addf %172, %263 : vector<8x128xf32>
    %c6_65 = arith.constant 6 : index
    %265 = memref.load %arg3[%c6_65] : memref<32xf32, #tpu.memory_space<smem>>
    %266 = vector.broadcast %265 : f32 to vector<8x128xf32>
    %267 = arith.mulf %260, %266 : vector<8x128xf32>
    %268 = arith.addf %176, %267 : vector<8x128xf32>
    %c10_66 = arith.constant 10 : index
    %269 = memref.load %arg3[%c10_66] : memref<32xf32, #tpu.memory_space<smem>>
    %270 = vector.broadcast %269 : f32 to vector<8x128xf32>
    %271 = arith.mulf %260, %270 : vector<8x128xf32>
    %272 = arith.addf %180, %271 : vector<8x128xf32>
    %c14_67 = arith.constant 14 : index
    %273 = memref.load %arg3[%c14_67] : memref<32xf32, #tpu.memory_space<smem>>
    %274 = vector.broadcast %273 : f32 to vector<8x128xf32>
    %275 = arith.mulf %260, %274 : vector<8x128xf32>
    %276 = arith.addf %184, %275 : vector<8x128xf32>
    %c18_68 = arith.constant 18 : index
    %277 = memref.load %arg3[%c18_68] : memref<32xf32, #tpu.memory_space<smem>>
    %278 = vector.broadcast %277 : f32 to vector<8x128xf32>
    %279 = arith.mulf %260, %278 : vector<8x128xf32>
    %280 = arith.addf %188, %279 : vector<8x128xf32>
    %c22_69 = arith.constant 22 : index
    %281 = memref.load %arg3[%c22_69] : memref<32xf32, #tpu.memory_space<smem>>
    %282 = vector.broadcast %281 : f32 to vector<8x128xf32>
    %283 = arith.mulf %260, %282 : vector<8x128xf32>
    %284 = arith.addf %192, %283 : vector<8x128xf32>
    %c26_70 = arith.constant 26 : index
    %285 = memref.load %arg3[%c26_70] : memref<32xf32, #tpu.memory_space<smem>>
    %286 = vector.broadcast %285 : f32 to vector<8x128xf32>
    %287 = arith.mulf %260, %286 : vector<8x128xf32>
    %288 = arith.addf %196, %287 : vector<8x128xf32>
    %c30 = arith.constant 30 : index
    %289 = memref.load %arg3[%c30] : memref<32xf32, #tpu.memory_space<smem>>
    %290 = vector.broadcast %289 : f32 to vector<8x128xf32>
    %291 = arith.mulf %260, %290 : vector<8x128xf32>
    %292 = arith.addf %200, %291 : vector<8x128xf32>
    %c0_71 = arith.constant 0 : index
    %c3_72 = arith.constant 3 : index
    %c0_73 = arith.constant 0 : index
    %c0_74 = arith.constant 0 : index
    %293 = vector.load %arg5[%c0_71, %c3_72, %c0_73, %c0_74] : memref<1x4x8x130xf32, #tpu.memory_space<vmem>>, vector<1x1x8x130xf32>
    %294 = vector.shape_cast %293 : vector<1x1x8x130xf32> to vector<8x130xf32>
    %c0_75 = arith.constant 0 : index
    %c3_76 = arith.constant 3 : index
    %c0_77 = arith.constant 0 : index
    %c0_78 = arith.constant 0 : index
    %295 = vector.load %arg6[%c0_75, %c3_76, %c0_77, %c0_78] : memref<1x4x8x130xf32, #tpu.memory_space<vmem>>, vector<1x1x8x130xf32>
    %296 = vector.shape_cast %295 : vector<1x1x8x130xf32> to vector<8x130xf32>
    %cst_79 = arith.constant 0.000000e+00 : f32
    %297 = vector.broadcast %cst_79 : f32 to vector<8x128xf32>
    %c27 = arith.constant 27 : index
    %298 = memref.load %arg2[%c27] : memref<36xf32, #tpu.memory_space<smem>>
    %299 = vector.extract_strided_slice %294 {offsets = [0, 0], sizes = [8, 128], strides = [1, 1]} : vector<8x130xf32> to vector<8x128xf32>
    %300 = vector.broadcast %298 : f32 to vector<8x128xf32>
    %301 = arith.mulf %299, %300 : vector<8x128xf32>
    %302 = arith.addf %297, %301 : vector<8x128xf32>
    %c28_80 = arith.constant 28 : index
    %303 = memref.load %arg2[%c28_80] : memref<36xf32, #tpu.memory_space<smem>>
    %304 = vector.extract_strided_slice %294 {offsets = [0, 1], sizes = [8, 128], strides = [1, 1]} : vector<8x130xf32> to vector<8x128xf32>
    %305 = vector.broadcast %303 : f32 to vector<8x128xf32>
    %306 = arith.mulf %304, %305 : vector<8x128xf32>
    %307 = arith.addf %302, %306 : vector<8x128xf32>
    %c29_81 = arith.constant 29 : index
    %308 = memref.load %arg2[%c29_81] : memref<36xf32, #tpu.memory_space<smem>>
    %309 = vector.extract_strided_slice %294 {offsets = [0, 2], sizes = [8, 128], strides = [1, 1]} : vector<8x130xf32> to vector<8x128xf32>
    %310 = vector.broadcast %308 : f32 to vector<8x128xf32>
    %311 = arith.mulf %309, %310 : vector<8x128xf32>
    %312 = arith.addf %307, %311 : vector<8x128xf32>
    %c7_i32_82 = arith.constant 7 : i32
    %313 = vector.broadcast %c7_i32_82 : i32 to vector<8x130xi32>
    %314 = arith.cmpi slt, %0, %313 : vector<8x130xi32>
    %c7_i32_83 = arith.constant 7 : i32
    %315 = tpu.dynamic_rotate %294 by %c7_i32_83 dim 0 : vector<8x130xf32>, i32 -> vector<8x130xf32>
    %c7_i32_84 = arith.constant 7 : i32
    %316 = tpu.dynamic_rotate %296 by %c7_i32_84 dim 0 : vector<8x130xf32>, i32 -> vector<8x130xf32>
    %317 = arith.select %314, %315, %316 : vector<8x130xi1>, vector<8x130xf32>
    %c30_85 = arith.constant 30 : index
    %318 = memref.load %arg2[%c30_85] : memref<36xf32, #tpu.memory_space<smem>>
    %319 = vector.extract_strided_slice %317 {offsets = [0, 0], sizes = [8, 128], strides = [1, 1]} : vector<8x130xf32> to vector<8x128xf32>
    %320 = vector.broadcast %318 : f32 to vector<8x128xf32>
    %321 = arith.mulf %319, %320 : vector<8x128xf32>
    %322 = arith.addf %312, %321 : vector<8x128xf32>
    %c31 = arith.constant 31 : index
    %323 = memref.load %arg2[%c31] : memref<36xf32, #tpu.memory_space<smem>>
    %324 = vector.extract_strided_slice %317 {offsets = [0, 1], sizes = [8, 128], strides = [1, 1]} : vector<8x130xf32> to vector<8x128xf32>
    %325 = vector.broadcast %323 : f32 to vector<8x128xf32>
    %326 = arith.mulf %324, %325 : vector<8x128xf32>
    %327 = arith.addf %322, %326 : vector<8x128xf32>
    %c32 = arith.constant 32 : index
    %328 = memref.load %arg2[%c32] : memref<36xf32, #tpu.memory_space<smem>>
    %329 = vector.extract_strided_slice %317 {offsets = [0, 2], sizes = [8, 128], strides = [1, 1]} : vector<8x130xf32> to vector<8x128xf32>
    %330 = vector.broadcast %328 : f32 to vector<8x128xf32>
    %331 = arith.mulf %329, %330 : vector<8x128xf32>
    %332 = arith.addf %327, %331 : vector<8x128xf32>
    %c6_i32_86 = arith.constant 6 : i32
    %333 = vector.broadcast %c6_i32_86 : i32 to vector<8x130xi32>
    %334 = arith.cmpi slt, %0, %333 : vector<8x130xi32>
    %c6_i32_87 = arith.constant 6 : i32
    %335 = tpu.dynamic_rotate %294 by %c6_i32_87 dim 0 : vector<8x130xf32>, i32 -> vector<8x130xf32>
    %c6_i32_88 = arith.constant 6 : i32
    %336 = tpu.dynamic_rotate %296 by %c6_i32_88 dim 0 : vector<8x130xf32>, i32 -> vector<8x130xf32>
    %337 = arith.select %334, %335, %336 : vector<8x130xi1>, vector<8x130xf32>
    %c33 = arith.constant 33 : index
    %338 = memref.load %arg2[%c33] : memref<36xf32, #tpu.memory_space<smem>>
    %339 = vector.extract_strided_slice %337 {offsets = [0, 0], sizes = [8, 128], strides = [1, 1]} : vector<8x130xf32> to vector<8x128xf32>
    %340 = vector.broadcast %338 : f32 to vector<8x128xf32>
    %341 = arith.mulf %339, %340 : vector<8x128xf32>
    %342 = arith.addf %332, %341 : vector<8x128xf32>
    %c34 = arith.constant 34 : index
    %343 = memref.load %arg2[%c34] : memref<36xf32, #tpu.memory_space<smem>>
    %344 = vector.extract_strided_slice %337 {offsets = [0, 1], sizes = [8, 128], strides = [1, 1]} : vector<8x130xf32> to vector<8x128xf32>
    %345 = vector.broadcast %343 : f32 to vector<8x128xf32>
    %346 = arith.mulf %344, %345 : vector<8x128xf32>
    %347 = arith.addf %342, %346 : vector<8x128xf32>
    %c35 = arith.constant 35 : index
    %348 = memref.load %arg2[%c35] : memref<36xf32, #tpu.memory_space<smem>>
    %349 = vector.extract_strided_slice %337 {offsets = [0, 2], sizes = [8, 128], strides = [1, 1]} : vector<8x130xf32> to vector<8x128xf32>
    %350 = vector.broadcast %348 : f32 to vector<8x128xf32>
    %351 = arith.mulf %349, %350 : vector<8x128xf32>
    %352 = arith.addf %347, %351 : vector<8x128xf32>
    %c3_89 = arith.constant 3 : index
    %353 = memref.load %arg3[%c3_89] : memref<32xf32, #tpu.memory_space<smem>>
    %354 = vector.broadcast %353 : f32 to vector<8x128xf32>
    %355 = arith.mulf %352, %354 : vector<8x128xf32>
    %356 = arith.addf %264, %355 : vector<8x128xf32>
    %c7_90 = arith.constant 7 : index
    %357 = memref.load %arg3[%c7_90] : memref<32xf32, #tpu.memory_space<smem>>
    %358 = vector.broadcast %357 : f32 to vector<8x128xf32>
    %359 = arith.mulf %352, %358 : vector<8x128xf32>
    %360 = arith.addf %268, %359 : vector<8x128xf32>
    %c11_91 = arith.constant 11 : index
    %361 = memref.load %arg3[%c11_91] : memref<32xf32, #tpu.memory_space<smem>>
    %362 = vector.broadcast %361 : f32 to vector<8x128xf32>
    %363 = arith.mulf %352, %362 : vector<8x128xf32>
    %364 = arith.addf %272, %363 : vector<8x128xf32>
    %c15_92 = arith.constant 15 : index
    %365 = memref.load %arg3[%c15_92] : memref<32xf32, #tpu.memory_space<smem>>
    %366 = vector.broadcast %365 : f32 to vector<8x128xf32>
    %367 = arith.mulf %352, %366 : vector<8x128xf32>
    %368 = arith.addf %276, %367 : vector<8x128xf32>
    %c19_93 = arith.constant 19 : index
    %369 = memref.load %arg3[%c19_93] : memref<32xf32, #tpu.memory_space<smem>>
    %370 = vector.broadcast %369 : f32 to vector<8x128xf32>
    %371 = arith.mulf %352, %370 : vector<8x128xf32>
    %372 = arith.addf %280, %371 : vector<8x128xf32>
    %c23_94 = arith.constant 23 : index
    %373 = memref.load %arg3[%c23_94] : memref<32xf32, #tpu.memory_space<smem>>
    %374 = vector.broadcast %373 : f32 to vector<8x128xf32>
    %375 = arith.mulf %352, %374 : vector<8x128xf32>
    %376 = arith.addf %284, %375 : vector<8x128xf32>
    %c27_95 = arith.constant 27 : index
    %377 = memref.load %arg3[%c27_95] : memref<32xf32, #tpu.memory_space<smem>>
    %378 = vector.broadcast %377 : f32 to vector<8x128xf32>
    %379 = arith.mulf %352, %378 : vector<8x128xf32>
    %380 = arith.addf %288, %379 : vector<8x128xf32>
    %c31_96 = arith.constant 31 : index
    %381 = memref.load %arg3[%c31_96] : memref<32xf32, #tpu.memory_space<smem>>
    %382 = vector.broadcast %381 : f32 to vector<8x128xf32>
    %383 = arith.mulf %352, %382 : vector<8x128xf32>
    %384 = arith.addf %292, %383 : vector<8x128xf32>
    %c0_97 = arith.constant 0 : index
    %c0_98 = arith.constant 0 : index
    %c0_99 = arith.constant 0 : index
    %c0_100 = arith.constant 0 : index
    %385 = vector.load %arg7[%c0_97, %c0_98, %c0_99, %c0_100] : memref<1x8x8x128xf32, #tpu.memory_space<vmem>>, vector<1x1x8x128xf32>
    %386 = vector.shape_cast %385 : vector<1x1x8x128xf32> to vector<8x128xf32>
    %387 = vector.shape_cast %356 : vector<8x128xf32> to vector<1x1x8x128xf32>
    tpu.vector_store %arg7[%c0_97, %c0_98, %c0_99, %c0_100], %387 {strides = array<i32>} : memref<1x8x8x128xf32, #tpu.memory_space<vmem>>, vector<1x1x8x128xf32>,
    %c0_101 = arith.constant 0 : index
    %c1_102 = arith.constant 1 : index
    %c0_103 = arith.constant 0 : index
    %c0_104 = arith.constant 0 : index
    %388 = vector.load %arg7[%c0_101, %c1_102, %c0_103, %c0_104] : memref<1x8x8x128xf32, #tpu.memory_space<vmem>>, vector<1x1x8x128xf32>
    %389 = vector.shape_cast %388 : vector<1x1x8x128xf32> to vector<8x128xf32>
    %390 = vector.shape_cast %360 : vector<8x128xf32> to vector<1x1x8x128xf32>
    tpu.vector_store %arg7[%c0_101, %c1_102, %c0_103, %c0_104], %390 {strides = array<i32>} : memref<1x8x8x128xf32, #tpu.memory_space<vmem>>, vector<1x1x8x128xf32>,
    %c0_105 = arith.constant 0 : index
    %c2_106 = arith.constant 2 : index
    %c0_107 = arith.constant 0 : index
    %c0_108 = arith.constant 0 : index
    %391 = vector.load %arg7[%c0_105, %c2_106, %c0_107, %c0_108] : memref<1x8x8x128xf32, #tpu.memory_space<vmem>>, vector<1x1x8x128xf32>
    %392 = vector.shape_cast %391 : vector<1x1x8x128xf32> to vector<8x128xf32>
    %393 = vector.shape_cast %364 : vector<8x128xf32> to vector<1x1x8x128xf32>
    tpu.vector_store %arg7[%c0_105, %c2_106, %c0_107, %c0_108], %393 {strides = array<i32>} : memref<1x8x8x128xf32, #tpu.memory_space<vmem>>, vector<1x1x8x128xf32>,
    %c0_109 = arith.constant 0 : index
    %c3_110 = arith.constant 3 : index
    %c0_111 = arith.constant 0 : index
    %c0_112 = arith.constant 0 : index
    %394 = vector.load %arg7[%c0_109, %c3_110, %c0_111, %c0_112] : memref<1x8x8x128xf32, #tpu.memory_space<vmem>>, vector<1x1x8x128xf32>
    %395 = vector.shape_cast %394 : vector<1x1x8x128xf32> to vector<8x128xf32>
    %396 = vector.shape_cast %368 : vector<8x128xf32> to vector<1x1x8x128xf32>
    tpu.vector_store %arg7[%c0_109, %c3_110, %c0_111, %c0_112], %396 {strides = array<i32>} : memref<1x8x8x128xf32, #tpu.memory_space<vmem>>, vector<1x1x8x128xf32>,
    %c0_113 = arith.constant 0 : index
    %c4_114 = arith.constant 4 : index
    %c0_115 = arith.constant 0 : index
    %c0_116 = arith.constant 0 : index
    %397 = vector.load %arg7[%c0_113, %c4_114, %c0_115, %c0_116] : memref<1x8x8x128xf32, #tpu.memory_space<vmem>>, vector<1x1x8x128xf32>
    %398 = vector.shape_cast %397 : vector<1x1x8x128xf32> to vector<8x128xf32>
    %399 = vector.shape_cast %372 : vector<8x128xf32> to vector<1x1x8x128xf32>
    tpu.vector_store %arg7[%c0_113, %c4_114, %c0_115, %c0_116], %399 {strides = array<i32>} : memref<1x8x8x128xf32, #tpu.memory_space<vmem>>, vector<1x1x8x128xf32>,
    %c0_117 = arith.constant 0 : index
    %c5_118 = arith.constant 5 : index
    %c0_119 = arith.constant 0 : index
    %c0_120 = arith.constant 0 : index
    %400 = vector.load %arg7[%c0_117, %c5_118, %c0_119, %c0_120] : memref<1x8x8x128xf32, #tpu.memory_space<vmem>>, vector<1x1x8x128xf32>
    %401 = vector.shape_cast %400 : vector<1x1x8x128xf32> to vector<8x128xf32>
    %402 = vector.shape_cast %376 : vector<8x128xf32> to vector<1x1x8x128xf32>
    tpu.vector_store %arg7[%c0_117, %c5_118, %c0_119, %c0_120], %402 {strides = array<i32>} : memref<1x8x8x128xf32, #tpu.memory_space<vmem>>, vector<1x1x8x128xf32>,
    %c0_121 = arith.constant 0 : index
    %c6_122 = arith.constant 6 : index
    %c0_123 = arith.constant 0 : index
    %c0_124 = arith.constant 0 : index
    %403 = vector.load %arg7[%c0_121, %c6_122, %c0_123, %c0_124] : memref<1x8x8x128xf32, #tpu.memory_space<vmem>>, vector<1x1x8x128xf32>
    %404 = vector.shape_cast %403 : vector<1x1x8x128xf32> to vector<8x128xf32>
    %405 = vector.shape_cast %380 : vector<8x128xf32> to vector<1x1x8x128xf32>
    tpu.vector_store %arg7[%c0_121, %c6_122, %c0_123, %c0_124], %405 {strides = array<i32>} : memref<1x8x8x128xf32, #tpu.memory_space<vmem>>, vector<1x1x8x128xf32>,
    %c0_125 = arith.constant 0 : index
    %c7_126 = arith.constant 7 : index
    %c0_127 = arith.constant 0 : index
    %c0_128 = arith.constant 0 : index
    %406 = vector.load %arg7[%c0_125, %c7_126, %c0_127, %c0_128] : memref<1x8x8x128xf32, #tpu.memory_space<vmem>>, vector<1x1x8x128xf32>
    %407 = vector.shape_cast %406 : vector<1x1x8x128xf32> to vector<8x128xf32>
    %408 = vector.shape_cast %384 : vector<8x128xf32> to vector<1x1x8x128xf32>
    tpu.vector_store %arg7[%c0_125, %c7_126, %c0_127, %c0_128], %408 {strides = array<i32>} : memref<1x8x8x128xf32, #tpu.memory_space<vmem>>, vector<1x1x8x128xf32>,
    return
  }
  func.func @transform_0(%arg0: i32, %arg1: i32) -> i32 {
    %c0_i32 = arith.constant 0 : i32
    %c0_i32_0 = arith.constant 0 : i32
    return %c0_i32 : i32
  }
  func.func @transform_1(%arg0: i32, %arg1: i32) -> i32 {
    %c0_i32 = arith.constant 0 : i32
    %c0_i32_0 = arith.constant 0 : i32
    return %c0_i32 : i32
  }
  func.func @transform_2(%arg0: i32, %arg1: i32) -> i32 {
    %c0_i32 = arith.constant 0 : i32
    %c0_i32_0 = arith.constant 0 : i32
    return %c0_i32 : i32
  }
  func.func @transform_3(%arg0: i32, %arg1: i32) -> (i32, i32, i32, i32) {
    %c0_i32 = arith.constant 0 : i32
    %c0_i32_0 = arith.constant 0 : i32
    %c0_i32_1 = arith.constant 0 : i32
    return %arg0, %c0_i32, %arg1, %c0_i32_0 : i32, i32, i32, i32
  }
  func.func @transform_4(%arg0: i32, %arg1: i32) -> (i32, i32, i32, i32) {
    %c1_i32 = arith.constant 1 : i32
    %0 = arith.addi %arg1, %c1_i32 : i32
    %c1_i32_0 = arith.constant 1 : i32
    %1 = arith.muli %0, %c1_i32_0 : i32
    %c1_i32_1 = arith.constant 1 : i32
    %2 = arith.minsi %1, %c1_i32_1 : i32
    %c0_i32 = arith.constant 0 : i32
    %c0_i32_2 = arith.constant 0 : i32
    %c0_i32_3 = arith.constant 0 : i32
    return %arg0, %c0_i32, %2, %c0_i32_2 : i32, i32, i32, i32
  }
  func.func @transform_5(%arg0: i32, %arg1: i32) -> (i32, i32, i32, i32) {
    %c0_i32 = arith.constant 0 : i32
    %c0_i32_0 = arith.constant 0 : i32
    %c0_i32_1 = arith.constant 0 : i32
    return %arg0, %c0_i32, %arg1, %c0_i32_0 : i32, i32, i32, i32
  }
}

</mosaic_0001>

<bundles_post_ra>
// kernel: depthwise_conv_forward.1
= control target key start
LH: loop header
LB: loop body
LE: loop exit
PB: predicated region body
PF: predicated region fallthrough
CT: control target
= control target key end

     0   :  { %s2158_s0 = inlined_call_operand.vmem [shape: f32[36], index: 0, kind: input, shape index: {}]   ;;  %s2159_s1 = inlined_call_operand.vmem [shape: f32[32], index: 1, kind: input, shape index: {}]   ;;  %s2160_s2 = inlined_call_operand.vmem [shape: f32[8], index: 2, kind: input, shape index: {}]   ;;  %s2161_s3 = inlined_call_operand.vmem [shape: f32[2,4,16,130], index: 3, kind: input, shape index: {}, may-alias: {3,4}]   ;;  %s2162_s4 = inlined_call_operand.vmem [shape: f32[2,4,16,130], index: 4, kind: input, shape index: {}, may-alias: {3,4}]   ;;  %s2163_s5 = inlined_call_operand.vmem [shape: f32[2,8,14,128], index: 5, kind: output, shape index: {}]  }
   0x1   :  { %2171 = sst [smem:[#allocation17_spill]] %s2158_s0 }
   0x2   :  { %2172 = sst [smem:[#allocation18_spill]] %s2159_s1 }
   0x3   :  { %2173 = sst [smem:[#allocation19_spill]] %s2160_s2 }
   0x4   :  { %2174 = sst [smem:[#allocation20_spill]] %s2161_s3 }
   0x5   :  { %2175 = sst [smem:[#allocation21_spill]] %s2162_s4 }
   0x6   :  { %10 = vsyncpa [#allocation3], 0 }
   0x7   :  { %11 = vsyncpa [#allocation5], 0  ;;  %s1558_s18 = smov 0   ;;  %s1560_s19 = smov 0  }
   0x8   :  { %s1562_s20 = smov 0   ;;  %s1564_s21 = smov 0  }
   0x9   :  { %s1566_s22 = smov 0   ;;  %s1568_s23 = smov 0  }
   0xa   :  { %s1570_s24 = smov 0   ;;  %s1572_s25 = smov 0  }
   0xb   :  { %s1574_s26 = smov 0  }
   0xc LB: > { %2176 = sst [smem:[#allocation12_spill]] %s1513_s24  ;;  %s1171_s27 = sadd.s32 4294967295, %s1521_s26   ;;  %s1521_s26 = sphi %s1574_s26, %s17_s26   ;;  %s1517_s25 = sphi %s1572_s25, %s2201_s25   ;;  %s1513_s24 = sphi %s1570_s24, %s2200_s24   ;;  %s1509_s23 = sphi %s1568_s23, %s2207_s23   ;;  %s1505_s22 = sphi %s1566_s22, %s2206_s22   ;;  %s1501_s21 = sphi %s1564_s21, %s2205_s21   ;;  %s1497_s20 = sphi %s1562_s20, %s2204_s20   ;;  %s1493_s19 = sphi %s1560_s19, %s2203_s19   ;;  %s1489_s18 = sphi %s1558_s18, %s2202_s18  }
   0xd   : > { %2177 = sst [smem:[#allocation13_spill]] %s1517_s25  ;;  %s26_s28 = sadd.s32 1, %s1513_s24 }
   0xe   : > { %p27_p0 = scmp.ge.s32.totalorder %s26_s28, 2  ;;  %s29_s29 = sadd.s32 1, %s1517_s25 }
   0xf   : > { %s101_s30 = sadd.s32 1, %s1501_s21  ;;  %p108_p1 = scmp.ne.s32.totalorder %s1501_s21, %s1497_s20 }
  0x10   : > { %s2209_s28 = smov (%p27_p0, %s26_s28), 0  ;;  %s2211_s29 = smov (!%p27_p0, %s29_s29), %s1517_s25 }
  0x11   : > { %2178 = sst [smem:[#allocation14_spill]] %s2209_s28  ;;  %s97_s6 = ssub.s32 %s1513_s24, %s2209_s28 }
  0x12   : > { %p109_p2 = scmp.eq.s32.totalorder %s1521_s26, 0  ;;  %p31_p3 = scmp.ge.s32.totalorder %s2211_s29, 2 }
  0x13   : > { %s135_s10 = sadd.s32 1, %s1493_s19  ;;  %p142_p6 = scmp.ne.s32.totalorder %s1493_s19, %s1489_s18 }
  0x14   : > { %p1618_p4 = por %p109_p2, %p108_p1  ;;  %s2213_s29 = smov (%p31_p3, %s2211_s29), 0 }
  0x15   : > { %2180 = sst [smem:[#allocation15_spill]] %s2213_s29  ;;  %s96_s8 = ssub.s32 %s1517_s25, %s2213_s29 }
  0x16   : > { %s2179_s7 = scalar_select %p1618_p4, 1, 0 }
  0x17   : > { %s98_s9 = sor.u32 %s97_s6, %s96_s8  ;;  %p1632_p7 = por %p142_p6, %p109_p2 }
  0x18   : > { %p99_p5 = scmp.eq.s32.totalorder %s98_s9, 0  ;;  %p174_p8 = scmp.eq.s32.totalorder %s1171_s27, 3 }
  0x19   : > { %s2182_s12 = scalar_select %p1632_p7, 1, 0 }
  0x1a   : > { %s1630_s11 = scalar_select %p99_p5, %s1501_s21, %s101_s30  }
  0x1b   : > { %p133_p9 = scmp.eq.s32.totalorder %s96_s8, 0  ;;  %p1173_p10 = scmp.ge.s32.totalorder %s1521_s26, 1 }
  0x1c   : > { %2181 = sst [smem:[#allocation16_spill]] %s1630_s11  ;;  %p1640_p11 = por %p174_p8, %p108_p1 }
  0x1d   : > { %p187_p12 = scmp.lt.s32.totalorder %s1521_s26, 5  ;;  %p1652_p0 = scmp.eq.s32.totalorder %s1171_s27, 0 }
  0x1e   : > { %s2183_s13 = scalar_select %p1640_p11, 1, 0 }
  0x1f   : > { %s1646_s14 = scalar_select %p133_p9, %s1493_s19, %s135_s10  }
  0x20   : > { %p1648_p13 = pnand %p1173_p10, %p187_p12  ;;  %s2186_s1 = sld [smem:[#allocation18_spill]] }
  0x21   : > { %s2185_s16 = scalar_select %p1652_p0, 1, 0 }
  0x22   : > { %s2184_s15 = scalar_select %p1648_p13, 1, 0 }
  0x23   : > { %p1302_p1 = pneg %p1648_p13  ;;  %s2188_s0 = sld [smem:[#allocation17_spill]] }
  0x25   : > { %p1663_p2 = pnand %p1652_p0, %p1302_p1 }
  0x26   : > { %s211_s6 = sshll.u32 %s2186_s1, 4  ;;  %s212_s6 = int_to_ptr.vmem [resolvable:$true] %s211_s6 }
  0x27   : > { %s1395_s29 = scalar_lea.vmem %s212_s6, 16  ;;  %p1397_p5 = pneg %p1663_p2 }
  0x28   : > { %p1396_p3 = scmp.ne.s32.totalorder %s212_s6, %s1395_s29  ;;  %p1403_p9 = scmp.lt.s32.totalorder %s212_s6, %s212_s6 }
  0x29   : > { %s200_s27 = sshll.u32 %s2188_s0, 4  ;;  %p1404_p10 = scmp.lt.s32.totalorder %s1395_s29, %s1395_s29  ;;  %s201_s27 = int_to_ptr.vmem [resolvable:$true] %s200_s27 }
  0x2a   : > { %p1398_p6 = pnand %p1397_p5, %p1396_p3 }
  0x2b   : > { %p1405_p12 = por %p1404_p10, %p1403_p9 }
  0x2c   : > { %p1399_p8 = pneg %p1398_p6 }
  0x2e   : > { %p1406_p1 = pnand %p1405_p12, %p1399_p8 }
  0x30   : > { %1409 = shalt.err (!%p1406_p1)
}
  0x31   : > { %s1523_s17 = smov [#allocation4]   ;;  %s1410_s30 = scalar_lea.vmem %s201_s27, 16 }
  0x32   : > { %1308 = dma.vmem_to_smem (!%p1663_p2), %s212_s6, 16, %s1523_s17, [#allocation5]  }
  0x33   : > { %p1411_p11 = scmp.ne.s32.totalorder %s201_s27, %s1410_s30  ;;  %p1418_p7 = scmp.lt.s32.totalorder %s201_s27, %s201_s27 }
  0x34   : > { %p1419_p3 = scmp.lt.s32.totalorder %s1410_s30, %s1410_s30 }
  0x35   : > { %p1413_p0 = pnand %p1411_p11, %p1397_p5 }
  0x36   : > { %p1420_p6 = por %p1419_p3, %p1418_p7 }
  0x37   : > { %p1414_p13 = pneg %p1413_p0 }
  0x39   : > { %p1421_p4 = pnand %p1420_p6, %p1414_p13 }
  0x3b   : > { %1424 = shalt.err (!%p1421_p4)
}
  0x3c   : > { %s1524_s29 = smov [#allocation2]   ;;  %s2189_s2 = sld [smem:[#allocation19_spill]] }
  0x3d   : > { %1305 = dma.vmem_to_smem (!%p1663_p2), %s201_s27, 16, %s1524_s29, [#allocation3]  }
  0x42   : > { %s222_s6 = sshll.u32 %s2189_s2, 4  ;;  %s223_s6 = int_to_ptr.vmem [resolvable:$true] %s222_s6 }
  0x43   : > { %s1425_s17 = scalar_lea.vmem %s223_s6, 16  ;;  %p1433_p9 = scmp.lt.s32.totalorder %s223_s6, %s223_s6 }
  0x44   : > { %p1426_p8 = scmp.ne.s32.totalorder %s223_s6, %s1425_s17  ;;  %p1434_p7 = scmp.lt.s32.totalorder %s1425_s17, %s1425_s17 }
  0x46   : > { %p1428_p11 = pnand %p1426_p8, %p1397_p5  ;;  %p1435_p13 = por %p1434_p7, %p1433_p9 }
  0x48   : > { %p1429_p0 = pneg %p1428_p11 }
  0x4a   : > { %p1436_p4 = pnand %p1435_p13, %p1429_p0 }
  0x4c   : > { %1439 = shalt.err (!%p1436_p4)
}
  0x4d   : > { %s1525_s30 = smov [#allocation6]   ;;  %p1177_p10 = scmp.ge.s32.totalorder %s1521_s26, 4 }
  0x4e   : > { %1311 = dma.vmem_to_smem (!%p1663_p2), %s223_s6, 16, %s1525_s30, [#allocation5]  }
  0x4f   : > { %229 = sbr.rel (%p1177_p10) target bundleno = 115 (0x73), region = 28  ;;  %p2190_p12 = scmp.ne.s32.totalorder (!%p1177_p10), %s2179_s7, 0 }
  0x56   : > { %232 = sbr.rel (!%p2190_p12) target bundleno = 100 (0x64), region = 32  ;;  %s234_s27 = sand.u32 (%p2190_p12), 1, %s1501_s21  }
  0x57   : > { %s1179_s29 = sshll.u32 (%p2190_p12), %s1513_s24, 1  ;;  %s1178_s9 = sshll.u32 (%p2190_p12), %s234_s27, 6 }
  0x58   : > { %s1180_s10 = sshll.u32 (%p2190_p12), %s1517_s25, 4  ;;  %s2191_s3 = sld [smem:[#allocation20_spill]] (%p2190_p12) }
  0x59   : > { %s239_s17 = sadd.s32 (%p2190_p12), %s1180_s10, %s1179_s29  ;;  %s236_s6 = scalar_lea.vmem (%p2190_p12), [#allocation7], %s1178_s9 }
  0x5a   : > { %s1181_s0 = sshll.u32 (%p2190_p12), %s239_s17, 3 }
  0x5e   : > { %s241_s8 = scalar_lea.vmem %s2191_s3, %s1181_s0 }
  0x5f   : > { %v254_v0 = vld [vmem:[%s241_s8] sm:$0xff]  ;;  %v256_v1 = vld [vmem:[%s241_s8 + $0x8] sm:$0xff] }
  0x60   : > { %v258_v2 = vld [vmem:[%s241_s8 + $0x20] sm:$0xff]  ;;  %255 = vst [vmem:[%s236_s6] sm:$0xff] %v254_v0  ;;  %257 = vst [vmem:[%s236_s6 + $0x8] sm:$0xff] %v256_v1  ;;  %v260_v3 = vld [vmem:[%s241_s8 + $0x28] sm:$0xff] }
  0x61   : > { %259 = vst [vmem:[%s236_s6 + $0x10] sm:$0xff] %v258_v2  ;;  %v262_v4 = vld [vmem:[%s241_s8 + $0x40] sm:$0xff]  ;;  %v264_v5 = vld [vmem:[%s241_s8 + $0x48] sm:$0xff]  ;;  %261 = vst [vmem:[%s236_s6 + $0x18] sm:$0xff] %v260_v3 }
  0x62   : > { %263 = vst [vmem:[%s236_s6 + $0x20] sm:$0xff] %v262_v4  ;;  %265 = vst [vmem:[%s236_s6 + $0x28] sm:$0xff] %v264_v5  ;;  %v266_v6 = vld [vmem:[%s241_s8 + $0x60] sm:$0xff]  ;;  %v268_v7 = vld [vmem:[%s241_s8 + $0x68] sm:$0xff] }
  0x63   : > { %267 = vst [vmem:[%s236_s6 + $0x30] sm:$0xff] %v266_v6  ;;  %269 = vst [vmem:[%s236_s6 + $0x38] sm:$0xff] %v268_v7 }
  0x64 PF: > { %p2192_p2 = scmp.ne.s32.totalorder %s2182_s12, 0 }
  0x65   : > { %s277_s0 = sand.u32 (%p2192_p2), 1, %s1493_s19   ;;  %s1486_s2 = sshll.u32 (%p2192_p2), %s1517_s25, 7 }
  0x66   : > { %275 = sbr.rel (!%p2192_p2) target bundleno = 115 (0x73), region = 55  ;;  %s1182_s1 = sshll.u32 (%p2192_p2), %s277_s0, 6 }
  0x67   : > { %s1485_s7 = sadd.s32 (%p2192_p2), 16, %s1486_s2  ;;  %s2193_s4 = sld [smem:[#allocation21_spill]] (%p2192_p2) }
  0x68   : > { %s279_s9 = scalar_lea.vmem (%p2192_p2), [#allocation8], %s1182_s1 }
  0x6d   : > { %s287_s29 = scalar_lea.vmem %s2193_s4, %s1485_s7 }
  0x6e   : > { %v300_v8 = vld [vmem:[%s287_s29] sm:$0xff]  ;;  %v302_v9 = vld [vmem:[%s287_s29 + $0x8] sm:$0xff] }
  0x6f   : > { %v304_v10 = vld [vmem:[%s287_s29 + $0x20] sm:$0xff]  ;;  %301 = vst [vmem:[%s279_s9] sm:$0xff] %v300_v8  ;;  %303 = vst [vmem:[%s279_s9 + $0x8] sm:$0xff] %v302_v9  ;;  %v306_v11 = vld [vmem:[%s287_s29 + $0x28] sm:$0xff] }
  0x70   : > { %305 = vst [vmem:[%s279_s9 + $0x10] sm:$0xff] %v304_v10  ;;  %v308_v12 = vld [vmem:[%s287_s29 + $0x40] sm:$0xff]  ;;  %v310_v13 = vld [vmem:[%s287_s29 + $0x48] sm:$0xff]  ;;  %307 = vst [vmem:[%s279_s9 + $0x18] sm:$0xff] %v306_v11 }
  0x71   : > { %309 = vst [vmem:[%s279_s9 + $0x20] sm:$0xff] %v308_v12  ;;  %311 = vst [vmem:[%s279_s9 + $0x28] sm:$0xff] %v310_v13  ;;  %v312_v14 = vld [vmem:[%s287_s29 + $0x60] sm:$0xff]  ;;  %v314_v15 = vld [vmem:[%s287_s29 + $0x68] sm:$0xff] }
  0x72   : > { %313 = vst [vmem:[%s279_s9 + $0x30] sm:$0xff] %v312_v14  ;;  %315 = vst [vmem:[%s279_s9 + $0x38] sm:$0xff] %v314_v15 }
  0x73 PF: > { %p2194_p5 = scmp.ne.s32.totalorder %s2184_s15, 0 }
  0x74   : > { %p2195_p1 = scmp.ne.s32.totalorder (!%p2194_p5), %s2185_s16, 0 }
  0x75   : > { %324 = sbr.rel (%p2194_p5) target bundleno = 368 (0x170), region = 78 }
  0x7c   : > { %1477 = dma.done.wait (%p2195_p1), [#allocation3], 16  }
  0x7d   : > { %1479 = vsyncadd (%p2195_p1), [#allocation3], 4294967280 }
  0x7e   : > { %1481 = dma.done.wait (%p2195_p1), [#allocation5], 32  }
  0x7f   : > { %1483 = vsyncadd (%p2195_p1), [#allocation5], 4294967264  ;;  %s339_s12 = sand.u32 1, %s1497_s20   ;;  %s346_s10 = sand.u32 1, %s1489_s18  }
  0x80   : > { %s1718_s17 = sshll.u32 %s339_s12, 6  ;;  %s1191_s15 = sshll.u32 %s346_s10, 6 }
  0x81   : > { %s1721_s8 = scalar_lea.vmem [#allocation7], %s1718_s17  ;;  %s1723_s6 = scalar_lea.vmem [#allocation8], %s1191_s15 }
  0x82   : > { %352 = sfence }
  0x83   : > { %s1201_s0 = sld [smem:[#allocation2 + $0x2]]  ;;  %v380_v16 = vlaneseq  ;;  %s1200_s16 = sld [smem:[#allocation2 + $0x1]]  ;;  %v1728_v17 = vld [vmem:[%s1721_s8 + $0x8] sm:$0xff]  ;;  %v1736_v20 = vld [vmem:[%s1721_s8] sm:$0xff]  ;;  %v1767_v37 = vld [vmem:[%s1721_s8 + $0x10] sm:$0xff]  ;;  %vm430_vm2 = vcmask 1031168  }
  0x84   : > { %s1725_s1 = sld [smem:[#allocation2 + $0x4]]  ;;  %v1733_v19 = vld [vmem:[%s1723_s6 + $0x8] sm:$0xff]  ;;  %v1739_v21 = vld [vmem:[%s1723_s6] sm:$0xff]  ;;  %v436_v23 = vrot.slane %v1728_v17, 1  ;;  %v435_v25 = vrot.slane %v1736_v20, 1  ;;  %s1744_s18 = sld [smem:[#allocation2 + $0xa]] }
  0x85   : > { %v1730_v18 = vshrl.u32 %v380_v16, 7  ;;  %v438_v24 = vrot.slane %v1733_v19, 1  ;;  %v437_v28 = vrot.slane %v1739_v21, 1  ;;  %s1749_s20 = sld [smem:[#allocation2 + $0x5]]  ;;  %s1526_s2 = smov 126   ;;  %v1776_v43 = vld [vmem:[%s1721_s8 + $0x18] sm:$0xff] }
  0x86   : > { %s1527_s7 = smov 127   ;;  %s1221_s30 = sld [smem:[#allocation2 + $0xb]]  ;;  %v1783_v46 = vld [vmem:[%s1721_s8 + $0x20] sm:$0xff]  ;;  %v1790_v51 = vld [vmem:[%s1721_s8 + $0x28] sm:$0xff]  ;;  %v1797_v54 = vld [vmem:[%s1721_s8 + $0x30] sm:$0xff]  ;;  %v577_v60 = vrot.slane %v1776_v43, 1 }
  0x87   : > { %vm434_vm0 = vcmp.lt.s32.totalorder %v1730_v18, 7  ;;  %s1241_s27 = sld [smem:[#allocation2 + $0x13]]  ;;  %s1242_s29 = sld [smem:[#allocation2 + $0x14]]  ;;  %v1800_v56 = vld [vmem:[%s1723_s6 + $0x18] sm:$0xff]  ;;  %v1803_v57 = vld [vmem:[%s1723_s6 + $0x10] sm:$0xff]  ;;  %v576_v63 = vrot.slane %v1767_v37, 1 }
  0x88   : > { %v440_v32 = vsel %vm434_vm0, %v436_v23, %v438_v24  ;;  %v1761_v34 = vsel %vm434_vm0, %v435_v25, %v437_v28  ;;  %s1262_s9 = sld [smem:[#allocation2 + $0x1c]]  ;;  %s1223_s12 = sld [smem:[#allocation2 + $0xd]]  ;;  %v579_v61 = vrot.slane %v1800_v56, 1  ;;  %v1812_v62 = vld [vmem:[%s1721_s8 + $0x38] sm:$0xff]  ;;  %v578_v0 = vrot.slane %v1803_v57, 1  ;;  %v1831_v9 = vld [vmem:[%s1723_s6 + $0x28] sm:$0xff] }
  0x89   : > { %v421_v22 = vstv %s1201_s0  ;;  %v407_v27 = vstv %s1200_s16  ;;  %s1263_s10 = sld [smem:[#allocation2 + $0x1d]]  ;;  %s1224_s15 = sld [smem:[#allocation2 + $0xe]]  ;;  %v1834_v10 = vld [vmem:[%s1723_s6 + $0x20] sm:$0xff]  ;;  %v717_v14 = vrot.slane %v1790_v51, 1  ;;  %v719_v15 = vrot.slane %v1831_v9, 1 }
  0x8a   : > { %v422_v26 = vmul.f32 %v421_v22, %v1736_v20  ;;  %v408_v29 = vmul.f32 %v407_v27, %v1736_v20  ;;  %v423_v30 = vmul.f32 %v421_v22, %v1728_v17  ;;  %v409_v31 = vmul.f32 %v407_v27, %v1728_v17  ;;  %s1826_s8 = sld [smem:[#allocation2 + $0x16]]  ;;  %s1206_s0 = sld [smem:[#allocation2 + $0x7]] }
  0x8b   : > { %v446_v33 = vstv %s1725_s1  ;;  %v551_v38 = vstv %s1744_s18  ;;  %v459_v39 = vstv %s1749_s20  ;;  %v581_v3 = vsel %vm434_vm0, %v577_v60, %v579_v61  ;;  %s1245_s16 = sld [smem:[#allocation2 + $0x17]]  ;;  %s1207_s18 = sld [smem:[#allocation2 + $0x8]] }
  0x8c   : > { %426 = vrot.lane.b32.xlu1 %v422_v26, %s1526_s2  ;;  %412 = vrot.lane.b32.xlu0 %v408_v29, %s1527_s7  ;;  %v448_v35 = vmul.f32 %v446_v33, %v440_v32  ;;  %v447_v36 = vmul.f32 %v446_v33, %v1761_v34  ;;  %v552_v40 = vmul.f32 %v1767_v37, %v551_v38  ;;  %v564_v42 = vstv %s1221_s30  ;;  %s1265_s1 = sld [smem:[#allocation2 + $0x1f]]  ;;  %s1266_s20 = sld [smem:[#allocation2 + $0x20]] }
  0x8d   : > { %v460_v41 = vmul.f32 %v459_v39, %v1761_v34  ;;  %v565_v44 = vmul.f32 %v1767_v37, %v564_v42  ;;  %v553_v45 = vmul.f32 %v1776_v43, %v551_v38  ;;  %v691_v47 = vstv %s1241_s27  ;;  %v1872_v38 = vld [vmem:[%s1723_s6 + $0x30] sm:$0xff]  ;;  %s1227_s30 = sld [smem:[#allocation2 + $0x11]]  ;;  %s2014_s3 = sld [smem:[#allocation4 + $0x1c]] }
  0x8e   : > { %v692_v48 = vmul.f32 %v1783_v46, %v691_v47  ;;  %v566_v49 = vmul.f32 %v1776_v43, %v564_v42  ;;  %v704_v50 = vstv %s1242_s29  ;;  %v693_v53 = vmul.f32 %v1790_v51, %v691_v47  ;;  %s1247_s27 = sld [smem:[#allocation2 + $0x19]]  ;;  %s1248_s29 = sld [smem:[#allocation2 + $0x1a]] }
  0x8f   : > { %v705_v52 = vmul.f32 %v1783_v46, %v704_v50  ;;  %v831_v55 = vstv %s1262_s9  ;;  %v706_v59 = vmul.f32 %v1790_v51, %v704_v50  ;;  %v461_v1 = vmul.f32 %v459_v39, %v440_v32  ;;  %s1268_s9 = sld [smem:[#allocation2 + $0x22]]  ;;  %s2016_s4 = sld [smem:[#allocation4 + $0x1]] }
  0x90   : > { %428 = vrot.lane.b32.xlu1 %v423_v30, %s1526_s2  ;;  %414 = vrot.lane.b32.xlu0 %v409_v31, %s1527_s7  ;;  %v832_v58 = vmul.f32 %v1797_v54, %v831_v55  ;;  %v833_v2 = vmul.f32 %v1812_v62, %v831_v55  ;;  %v587_v4 = vstv %s1223_s12  ;;  %v1823_v5 = vsel %vm434_vm0, %v576_v63, %v578_v0  ;;  %s1269_s12 = sld [smem:[#allocation2 + $0x23]]  ;;  %s2019_s28 = sld [smem:[#allocation4 + $0x5]] }
  0x91   : > { %v589_v6 = vmul.f32 %v587_v4, %v581_v3  ;;  %v588_v7 = vmul.f32 %v587_v4, %v1823_v5  ;;  %v844_v8 = vstv %s1263_s10  ;;  %v600_v13 = vstv %s1224_s15  ;;  %s402_s10 = sld [smem:[#allocation2]]  ;;  %s1202_s15 = sld [smem:[#allocation2 + $0x3]] }
  0x92   : > { %v846_v11 = vmul.f32 %v1812_v62, %v844_v8  ;;  %v845_v12 = vmul.f32 %v1797_v54, %v844_v8  ;;  %v716_v16 = vrot.slane %v1783_v46, 1  ;;  %v718_v22 = vrot.slane %v1834_v10, 1  ;;  %s2021_s25 = sld [smem:[#allocation4 + $0x9]]  ;;  %s2023_s24 = sld [smem:[#allocation4 + $0xd]] }
  0x93   : > { %v602_v23 = vmul.f32 %v600_v13, %v581_v3  ;;  %v727_v24 = vstv %s1826_s8  ;;  %v601_v25 = vmul.f32 %v600_v13, %v1823_v5  ;;  %v721_v26 = vsel %vm434_vm0, %v717_v14, %v719_v15  ;;  %s1240_s8 = sld [smem:[#allocation2 + $0x12]]  ;;  %s2036_s11 = sld [smem:[#allocation4 + $0x15]] }
  0x94   : > { %453 = vrot.lane.b32.xlu1 %v448_v35, %s1527_s7  ;;  %451 = vrot.lane.b32.xlu0 %v447_v36, %s1527_s7  ;;  %v473_v27 = vrot.slane %v1728_v17, 2  ;;  %v475_v28 = vrot.slane %v1733_v19, 2  ;;  %v1854_v29 = vsel %vm434_vm0, %v716_v16, %v718_v22  ;;  %vm471_vm1 = vcmp.lt.s32.totalorder %v1730_v18, 6  ;;  %v1869_v36 = vld [vmem:[%s1723_s6 + $0x38] sm:$0xff]  ;;  %s1226_s6 = sld [smem:[#allocation2 + $0x10]]  ;;  %p2196_p3 = scmp.ne.s32.totalorder %s2183_s13, 0 }
  0x95   : > { %v472_v30 = vrot.slane %v1736_v20, 2  ;;  %v474_v31 = vrot.slane %v1739_v21, 2  ;;  %v729_v32 = vmul.f32 %v727_v24, %v721_v26  ;;  %v728_v17 = vmul.f32 %v727_v24, %v1854_v29 }
  0x96   : > { %v477_v19 = vsel %vm471_vm1, %v473_v27, %v475_v28  ;;  %v483_v33 = vstv %s1206_s0  ;;  %v859_v42 = vrot.slane %v1869_v36, 1  ;;  %v867_v50 = vstv %s1265_s1  ;;  %s1243_s0 = sld [smem:[#allocation2 + $0x15]]  ;;  %s1261_s1 = sld [smem:[#allocation2 + $0x1b]] }
  0x97   : > { %v1866_v35 = vsel %vm471_vm1, %v472_v30, %v474_v31  ;;  %v485_v21 = vmul.f32 %v483_v33, %v477_v19  ;;  %v615_v60 = vrot.slane %v1800_v56, 2  ;;  %v612_v61 = vrot.slane %v1767_v37, 2 }
  0x98   : > { %556 = vrot.lane.b32.xlu1 %v552_v40, %s1527_s7  ;;  %464 = vrot.lane.b32.xlu0 %v460_v41, %s1526_s2  ;;  %v484_v39 = vmul.f32 %v483_v33, %v1866_v35  ;;  %v740_v40 = vstv %s1245_s16  ;;  %v857_v41 = vrot.slane %v1812_v62, 1  ;;  %v614_v63 = vrot.slane %v1803_v57, 2  ;;  %s1205_s16 = sld [smem:[#allocation2 + $0x6]] }
  0x99   : > { %v742_v47 = vmul.f32 %v740_v40, %v721_v26  ;;  %v880_v4 = vstv %s1266_s20  ;;  %v636_v8 = vstv %s1227_s30  ;;  %v752_v13 = vrot.slane %v1783_v46, 2  ;;  %s1246_s20 = sld [smem:[#allocation2 + $0x18]] }
  0x9a   : > { %v623_v3 = vstv %s1226_s6  ;;  %v754_v14 = vrot.slane %v1834_v10, 2  ;;  %v776_v24 = vstv %s1248_s29  ;;  %v895_v26 = vrot.slane %v1869_v36, 2  ;;  %s1225_s6 = sld [smem:[#allocation2 + $0xf]]  ;;  %s1978_s30 = sld [smem:[#allocation4]] }
  0x9b   : > { %v892_v27 = vrot.slane %v1797_v54, 2  ;;  %v894_v28 = vrot.slane %v1872_v38, 2  ;;  %v916_v36 = vstv %s1269_s12  ;;  %vm416_vm3 = vcmask 1039360   ;;  %s1982_s29 = sld [smem:[#allocation4 + $0x8]] }
  0x9c   : > { %569 = vrot.lane.b32.xlu1 %v565_v44, %s1526_s2  ;;  %558 = vrot.lane.b32.xlu0 %v553_v45, %s1527_s7  ;;  %v856_v44 = vrot.slane %v1797_v54, 1  ;;  %v858_v45 = vrot.slane %v1872_v38, 1  ;;  %s1988_s12 = sld [smem:[#allocation6]] }
  0xa0   : > { %696 = vrot.lane.b32.xlu1 %v692_v48, %s1527_s7  ;;  %571 = vrot.lane.b32.xlu0 %v566_v49, %s1526_s2  ;;  %v741_v48 = vmul.f32 %v740_v40, %v1854_v29  ;;  %v861_v49 = vsel %vm434_vm0, %v857_v41, %v859_v42 }
  0xa4   : > { %709 = vrot.lane.b32.xlu1 %v705_v52, %s1526_s2  ;;  %698 = vrot.lane.b32.xlu0 %v693_v53, %s1527_s7  ;;  %v1888_v52 = vsel %vm434_vm0, %v856_v44, %v858_v45  ;;  %v869_v53 = vmul.f32 %v867_v50, %v861_v49  ;;  %v442_v44 = vstv %s1202_s15  ;;  %s1992_s15 = sld [smem:[#allocation6 + $0x2]] }
  0xa5   : > { %v868_v55 = vmul.f32 %v867_v50, %v1888_v52  ;;  %v443_v50 = vmul.f32 %v442_v44, %v1761_v34  ;;  %v619_v44 = vstv %s1225_s6  ;;  %s2010_s6 = sld [smem:[#allocation4 + $0x14]] }
  0xa8   : > { %836 = vrot.lane.b32.xlu1 %v832_v58, %s1527_s7  ;;  %711 = vrot.lane.b32.xlu0 %v706_v59, %s1526_s2  ;;  %v496_v58 = vstv %s1207_s18  ;;  %v613_v59 = vrot.slane %v1776_v43, 2  ;;  %v1904_v43 = vsel %vm471_vm1, %v612_v61, %v614_v63  ;;  %s1264_s18 = sld [smem:[#allocation2 + $0x1e]] }
  0xa9   : > { %v498_v0 = vmul.f32 %v496_v58, %v477_v19  ;;  %v624_v57 = vmul.f32 %v623_v3, %v1904_v43  ;;  %v637_v16 = vmul.f32 %v636_v8, %v1904_v43 }
  0xac   : > { %466 = vrot.lane.b32.xlu1 %v461_v1, %s1526_s2  ;;  %838 = vrot.lane.b32.xlu0 %v833_v2, %s1527_s7  ;;  %v497_v1 = vmul.f32 %v496_v58, %v1866_v35  ;;  %v617_v2 = vsel %vm471_vm1, %v613_v59, %v615_v60 }
  0xad   : > { %v625_v56 = vmul.f32 %v623_v3, %v617_v2  ;;  %v638_v15 = vmul.f32 %v636_v8, %v617_v2 }
  0xb0   : > { %594 = vrot.lane.b32.xlu1 %v589_v6, %s1527_s7  ;;  %592 = vrot.lane.b32.xlu0 %v588_v7, %s1527_s7  ;;  %v882_v6 = vmul.f32 %v880_v4, %v861_v49  ;;  %v881_v7 = vmul.f32 %v880_v4, %v1888_v52 }
  0xb4   : > { %851 = vrot.lane.b32.xlu1 %v846_v11, %s1526_s2  ;;  %849 = vrot.lane.b32.xlu0 %v845_v12, %s1526_s2  ;;  %v753_v11 = vrot.slane %v1790_v51, 2  ;;  %v755_v12 = vrot.slane %v1831_v9, 2  ;;  %v1923_v51 = vsel %vm471_vm1, %v752_v13, %v754_v14 }
  0xb5   : > { %v777_v31 = vmul.f32 %v776_v24, %v1923_v51 }
  0xb6   : > { %v757_v22 = vsel %vm471_vm1, %v753_v11, %v755_v12  ;;  %v687_v11 = vstv %s1240_s8  ;;  %s1998_s8 = sld [smem:[#allocation6 + $0x5]] }
  0xb7   : > { %v778_v30 = vmul.f32 %v776_v24, %v757_v22  ;;  %v688_v14 = vmul.f32 %v1783_v46, %v687_v11 }
  0xb8   : > { %607 = vrot.lane.b32.xlu1 %v602_v23, %s1526_s2  ;;  %605 = vrot.lane.b32.xlu0 %v601_v25, %s1526_s2  ;;  %v763_v23 = vstv %s1247_s27  ;;  %v893_v25 = vrot.slane %v1812_v62, 2  ;;  %v1939_v62 = vsel %vm471_vm1, %v892_v27, %v894_v28  ;;  %s1980_s27 = sld [smem:[#allocation4 + $0x4]] }
  0xb9   : > { %v765_v9 = vmul.f32 %v763_v23, %v757_v22  ;;  %v764_v10 = vmul.f32 %v763_v23, %v1923_v51  ;;  %v723_v22 = vstv %s1243_s0  ;;  %s2000_s0 = sld [smem:[#allocation6 + $0x6]] }
  0xba   : > { %v724_v24 = vmul.f32 %v723_v22, %v1854_v29 }
  0xbc   : > { %734 = vrot.lane.b32.xlu1 %v729_v32, %s1527_s7  ;;  %732 = vrot.lane.b32.xlu0 %v728_v17, %s1527_s7  ;;  %v897_v32 = vsel %vm471_vm1, %v893_v25, %v895_v26  ;;  %v903_v17 = vstv %s1268_s9  ;;  %s1984_s9 = sld [smem:[#allocation4 + $0xc]] }
  0xbd   : > { %v905_v19 = vmul.f32 %v903_v17, %v897_v32  ;;  %v904_v33 = vmul.f32 %v903_v17, %v1939_v62  ;;  %v918_v38 = vmul.f32 %v916_v36, %v897_v32  ;;  %v827_v17 = vstv %s1261_s1  ;;  %s2006_s1 = sld [smem:[#allocation6 + $0x7]] }
  0xbe   : > { %v828_v29 = vmul.f32 %v1797_v54, %v827_v17  ;;  %v620_v54 = vmul.f32 %v619_v44, %v1904_v43  ;;  %v537_v17 = vstv %s2014_s3  ;;  %s2064_s3 = sld [smem:[#allocation4 + $0x2]] }
  0xc0   : > { %490 = vrot.lane.b32.xlu1 %v485_v21, %s1527_s7  ;;  %488 = vrot.lane.b32.xlu0 %v484_v39, %s1527_s7  ;;  %v917_v21 = vmul.f32 %v916_v36, %v1939_v62  ;;  %v403_v39 = vstv %s402_s10  ;;  %s1990_s10 = sld [smem:[#allocation6 + $0x1]] }
  0xc1   : > { %v404_v41 = vmul.f32 %v403_v39, %v1736_v20 }
  0xc4   : > { %747 = vrot.lane.b32.xlu1 %v742_v47, %s1526_s2  ;;  %745 = vrot.lane.b32.xlu0 %v741_v48, %s1526_s2 }
  0xc6   : > { %v385_v22 = vstv %s1990_s10  ;;  %s2089_s10 = sld [smem:[#allocation4 + $0x3]] }
  0xc8   : > { %874 = vrot.lane.b32.xlu1 %v869_v53, %s1527_s7  ;;  %872 = vrot.lane.b32.xlu0 %v868_v55, %s1527_s7 }
  0xcc   : > { %503 = vrot.lane.b32.xlu1 %v498_v0, %s1526_s2  ;;  %501 = vrot.lane.b32.xlu0 %v497_v1, %s1526_s2 }
  0xd0   : > { %630 = vrot.lane.b32.xlu1 %v625_v56, %s1527_s7  ;;  %628 = vrot.lane.b32.xlu0 %v624_v57, %s1527_s7 }
  0xd4   : > { %887 = vrot.lane.b32.xlu1 %v882_v6, %s1526_s2  ;;  %885 = vrot.lane.b32.xlu0 %v881_v7, %s1526_s2 }
  0xd8   : > { %643 = vrot.lane.b32.xlu1 %v638_v15, %s1526_s2  ;;  %641 = vrot.lane.b32.xlu0 %v637_v16, %s1526_s2 }
  0xdc   : > { %770 = vrot.lane.b32.xlu1 %v765_v9, %s1527_s7  ;;  %768 = vrot.lane.b32.xlu0 %v764_v10, %s1527_s7 }
  0xe0   : > { %783 = vrot.lane.b32.xlu1 %v778_v30, %s1526_s2  ;;  %781 = vrot.lane.b32.xlu0 %v777_v31, %s1526_s2 }
  0xe4   : > { %910 = vrot.lane.b32.xlu1 %v905_v19, %s1527_s7  ;;  %908 = vrot.lane.b32.xlu0 %v904_v33, %s1527_s7  ;;  %s1219_s7 = sld [smem:[#allocation2 + $0x9]] }
  0xe8   : > { %923 = vrot.lane.b32.xlu1 %v918_v38, %s1526_s2  ;;  %921 = vrot.lane.b32.xlu0 %v917_v21, %s1526_s2  ;;  %s1222_s2 = sld [smem:[#allocation2 + $0xc]]  ;;  %v863_v21 = vstv %s1264_s18  ;;  %s2008_s18 = sld [smem:[#allocation4 + $0x10]] }
  0xea   : > { %v547_v0 = vstv %s1219_s7  ;;  %s1994_s7 = sld [smem:[#allocation6 + $0x3]] }
  0xeb   : > { %v548_v2 = vmul.f32 %v1767_v37, %v547_v0 }
  0xee   : > { %v583_v57 = vstv %s1222_s2  ;;  %s1996_s2 = sld [smem:[#allocation6 + $0x4]] }
  0xef   : > { %v584_v7 = vmul.f32 %v583_v57, %v1823_v5  ;;  %v479_v5 = vstv %s1205_s16  ;;  %s2004_s16 = sld [smem:[#allocation2 + $0x21]] }
  0xf0   : > { %v480_v28 = vmul.f32 %v479_v5, %v1866_v35  ;;  %v864_v35 = vmul.f32 %v863_v21, %v1888_v52  ;;  %v389_v5 = vstv %s1994_s7  ;;  %v653_v21 = vstv %s2019_s28  ;;  %s2077_s28 = sld [smem:[#allocation4 + $0x12]]  ;;  %s2097_s7 = sld [smem:[#allocation4 + $0xb]] }
  0xfe   : > { %v427_v18 = vpop.permute.xlu1 %426  ;;  %v413_v40 = vpop.permute.xlu0 %412 }
 0x102   : > { %v429_v42 = vpop.permute.xlu1 %428  ;;  %v415_v47 = vpop.permute.xlu0 %414 }
 0x103   : > { %v431_v45 = vsel %vm430_vm2, %v427_v18, %v429_v42  ;;  %v417_v48 = vsel %vm416_vm3, %v413_v40, %v415_v47 }
 0x104   : > { %v419_v49 = vadd.f32 %v417_v48, %v404_v41 }
 0x106   : > { %v454_v53 = vpop.permute.xlu1 %453  ;;  %v433_v55 = vadd.f32 %v431_v45, %v419_v49  ;;  %v452_v58 = vpop.permute.xlu0 %451 }
 0x107   : > { %v455_v59 = vsel %vm416_vm3, %v452_v58, %v454_v53 }
 0x108   : > { %v444_v60 = vadd.f32 %v443_v50, %v433_v55 }
 0x10a   : > { %v557_v61 = vpop.permute.xlu1 %556  ;;  %v457_v20 = vadd.f32 %v455_v59, %v444_v60  ;;  %v465_v63 = vpop.permute.xlu0 %464 }
 0x10e   : > { %v570_v1 = vpop.permute.xlu1 %569  ;;  %v559_v3 = vpop.permute.xlu0 %558 }
 0x10f   : > { %v560_v56 = vsel %vm416_vm3, %v557_v61, %v559_v3 }
 0x110   : > { %v562_v4 = vadd.f32 %v560_v56, %v548_v2 }
 0x112   : > { %v697_v34 = vpop.permute.xlu1 %696  ;;  %v572_v6 = vpop.permute.xlu0 %571 }
 0x113   : > { %v573_v8 = vsel %vm430_vm2, %v570_v1, %v572_v6 }
 0x114   : > { %v575_v12 = vadd.f32 %v573_v8, %v562_v4  ;;  %v509_v8 = vstv %s1978_s30  ;;  %s2034_s30 = sld [smem:[#allocation4 + $0x11]] }
 0x116   : > { %v710_v13 = vpop.permute.xlu1 %709  ;;  %v699_v15 = vpop.permute.xlu0 %698  ;;  %v585_v37 = vadd.f32 %v584_v7, %v575_v12 }
 0x117   : > { %v700_v16 = vsel %vm416_vm3, %v697_v34, %v699_v15  ;;  %v521_v15 = vstv %s1984_s9  ;;  %s2081_s9 = sld [smem:[#allocation4 + $0x1a]] }
 0x118   : > { %v702_v9 = vadd.f32 %v700_v16, %v688_v14  ;;  %v517_v14 = vstv %s1982_s29  ;;  %v383_v16 = vstv %s1988_s12  ;;  %s2044_s29 = sld [smem:[#allocation4 + $0x1d]]  ;;  %s2083_s12 = sld [smem:[#allocation4 + $0x1e]] }
 0x11a   : > { %v837_v23 = vpop.permute.xlu1 %836  ;;  %v712_v10 = vpop.permute.xlu0 %711 }
 0x11b   : > { %v713_v25 = vsel %vm430_vm2, %v710_v13, %v712_v10  ;;  %v513_v13 = vstv %s1980_s27  ;;  %v899_v10 = vstv %s2004_s16  ;;  %s2042_s27 = sld [smem:[#allocation4 + $0x19]]  ;;  %s2108_s16 = sld [smem:[#allocation4 + $0x1b]] }
 0x11c   : > { %v715_v26 = vadd.f32 %v713_v25, %v702_v9  ;;  %v391_v25 = vstv %s1996_s2  ;;  %s2099_s2 = sld [smem:[#allocation4 + $0xf]] }
 0x11e   : > { %v467_v27 = vpop.permute.xlu1 %466  ;;  %v839_v30 = vpop.permute.xlu0 %838  ;;  %v725_v31 = vadd.f32 %v724_v24, %v715_v26 }
 0x11f   : > { %v468_v46 = vsel %vm430_vm2, %v465_v63, %v467_v27  ;;  %v840_v38 = vsel %vm416_vm3, %v837_v23, %v839_v30  ;;  %v759_v63 = vstv %s1246_s20  ;;  %s2012_s20 = sld [smem:[#allocation4 + $0x18]]  ;;  %v387_v23 = vstv %s1992_s15  ;;  %s2091_s15 = sld [smem:[#allocation4 + $0x7]] }
 0x120   : > { %v470_v32 = vadd.f32 %v468_v46, %v457_v20  ;;  %v842_v39 = vadd.f32 %v840_v38, %v828_v29  ;;  %v760_v2 = vmul.f32 %v759_v63, %v1923_v51  ;;  %v393_v27 = vstv %s1998_s8  ;;  %s2104_s8 = sld [smem:[#allocation4 + $0x13]] }
 0x121   : > { %v397_v46 = vstv %s2006_s1  ;;  %v525_v30 = vstv %s2008_s18  ;;  %v649_v38 = vstv %s2016_s4  ;;  %s2066_s4 = sld [smem:[#allocation4 + $0x6]]  ;;  %v677_v63 = vstv %s2044_s29  ;;  %s2110_s1 = sld [smem:[#allocation4 + $0x1f]] }
 0x122   : > { %v595_v19 = vpop.permute.xlu1 %594  ;;  %v1964_v33 = vadd.f32 %v480_v28, %v470_v32  ;;  %v593_v36 = vpop.permute.xlu0 %592  ;;  %v395_v28 = vstv %s2000_s0  ;;  %s2106_s0 = sld [smem:[#allocation4 + $0x17]]  ;;  %s376_s18 = scalar_lea.vmem [#allocation9], %s1718_s17 }
 0x123   : > { %v596_v41 = vsel %vm416_vm3, %v593_v36, %v595_v19 }
 0x124   : > { %v598_v48 = vadd.f32 %v596_v41, %v585_v37  ;;  %v661_v41 = vstv %s2023_s24  ;;  %s2073_s24 = sld [smem:[#allocation4 + $0xa]] }
 0x125   : > { %v533_v32 = vstv %s2012_s20 }
 0x126   : > { %v852_v18 = vpop.permute.xlu1 %851  ;;  %v850_v40 = vpop.permute.xlu0 %849 }
 0x127   : > { %v853_v42 = vsel %vm430_vm2, %v850_v40, %v852_v18  ;;  %v657_v18 = vstv %s2021_s25  ;;  %s2075_s25 = sld [smem:[#allocation4 + $0xe]] }
 0x128   : > { %v855_v45 = vadd.f32 %v853_v42, %v842_v39 }
 0x12a   : > { %v608_v47 = vpop.permute.xlu1 %607  ;;  %v606_v49 = vpop.permute.xlu0 %605  ;;  %v1971_v50 = vadd.f32 %v864_v35, %v855_v45 }
 0x12b   : > { %v609_v53 = vsel %vm430_vm2, %v606_v49, %v608_v47 }
 0x12c   : > { %v611_v55 = vadd.f32 %v609_v53, %v598_v48 }
 0x12e   : > { %v735_v58 = vpop.permute.xlu1 %734  ;;  %v733_v59 = vpop.permute.xlu0 %732  ;;  %v1975_v52 = vadd.f32 %v620_v54, %v611_v55  ;;  %v665_v55 = vstv %s2034_s30 }
 0x12f   : > { %v736_v20 = vsel %vm416_vm3, %v733_v59, %v735_v58  ;;  %v669_v58 = vstv %s2036_s11  ;;  %s2079_s11 = sld [smem:[#allocation4 + $0x16]] }
 0x130   : > { %v738_v1 = vadd.f32 %v736_v20, %v725_v31  ;;  %v529_v31 = vstv %s2010_s6  ;;  %v673_v20 = vstv %s2042_s27  ;;  %s1286_s6 = sshll.u32 (%p2196_p3), %s1509_s23, 4 }
 0x131   : > { %s983_s20 = sadd.s32 (%p2196_p3), %s1505_s22, %s1286_s6 }
 0x132   : > { %v491_v60 = vpop.permute.xlu1 %490  ;;  %v489_v61 = vpop.permute.xlu0 %488  ;;  %s1287_s17 = sshll.u32 (%p2196_p3), %s983_s20, 3 }
 0x133   : > { %v492_v6 = vsel %vm416_vm3, %v489_v61, %v491_v60  ;;  %s985_s29 = scalar_lea.vmem (%p2196_p3), %s2163_s5, %s1287_s17 }
 0x134   : > { %v494_v12 = vadd.f32 %v492_v6, %v1964_v33  ;;  %v900_v33 = vmul.f32 %v899_v10, %v1939_v62 }
 0x136   : > { %v748_v0 = vpop.permute.xlu1 %747  ;;  %v746_v43 = vpop.permute.xlu0 %745 }
 0x137   : > { %v749_v3 = vsel %vm430_vm2, %v746_v43, %v748_v0 }
 0x138   : > { %v751_v56 = vadd.f32 %v749_v3, %v738_v1 }
 0x13a   : > { %v875_v57 = vpop.permute.xlu1 %874  ;;  %v873_v34 = vpop.permute.xlu0 %872  ;;  %v2002_v51 = vadd.f32 %v760_v2, %v751_v56 }
 0x13b   : > { %v876_v24 = vsel %vm416_vm3, %v873_v34, %v875_v57 }
 0x13c   : > { %v878_v29 = vadd.f32 %v876_v24, %v1971_v50 }
 0x13e   : > { %v504_v4 = vpop.permute.xlu1 %503  ;;  %v502_v7 = vpop.permute.xlu0 %501 }
 0x13f   : > { %v505_v11 = vsel %vm430_vm2, %v502_v7, %v504_v4 }
 0x140   : > { %v507_v26 = vadd.f32 %v505_v11, %v494_v12 }
 0x142   : > { %v631_v37 = vpop.permute.xlu1 %630  ;;  %v629_v9 = vpop.permute.xlu0 %628  ;;  %v510_v39 = vmul.f32 %v509_v8, %v507_v26  ;;  %v514_v42 = vmul.f32 %v513_v13, %v507_v26  ;;  %v518_v44 = vmul.f32 %v517_v14, %v507_v26  ;;  %v522_v45 = vmul.f32 %v521_v15, %v507_v26 }
 0x143   : > { %v632_v40 = vsel %vm416_vm3, %v629_v9, %v631_v37  ;;  %v526_v47 = vmul.f32 %v525_v30, %v507_v26  ;;  %v530_v48 = vmul.f32 %v529_v31, %v507_v26  ;;  %v534_v49 = vmul.f32 %v533_v32, %v507_v26 }
 0x144   : > { %v538_v50 = vmul.f32 %v537_v17, %v507_v26  ;;  %v634_v53 = vadd.f32 %v632_v40, %v1975_v52  ;;  %v511_v61 = vadd.f32 %v510_v39, %v383_v16  ;;  %v515_v1 = vadd.f32 %v514_v42, %v385_v22 }
 0x145   : > { %v519_v52 = vadd.f32 %v518_v44, %v387_v23  ;;  %v523_v43 = vadd.f32 %v522_v45, %v389_v5  ;;  %v527_v3 = vadd.f32 %v526_v47, %v391_v25  ;;  %v531_v56 = vadd.f32 %v530_v48, %v393_v27 }
 0x146   : > { %v888_v19 = vpop.permute.xlu1 %887  ;;  %v886_v36 = vpop.permute.xlu0 %885  ;;  %v535_v57 = vadd.f32 %v534_v49, %v395_v28  ;;  %v539_v34 = vadd.f32 %v538_v50, %v397_v46  ;;  %v789_v30 = vstv %s2064_s3  ;;  %v793_v32 = vstv %s2066_s4 }
 0x147   : > { %v889_v35 = vsel %vm430_vm2, %v886_v36, %v888_v19  ;;  %v797_v17 = vstv %s2073_s24  ;;  %v801_v19 = vstv %s2075_s25  ;;  %v813_v36 = vstv %s2081_s9 }
 0x148   : > { %v891_v62 = vadd.f32 %v889_v35, %v878_v29  ;;  %v809_v29 = vstv %s2079_s11 }
 0x14a   : > { %v644_v54 = vpop.permute.xlu1 %643  ;;  %v642_v59 = vpop.permute.xlu0 %641  ;;  %v2068_v60 = vadd.f32 %v900_v33, %v891_v62  ;;  %v805_v33 = vstv %s2077_s28 }
 0x14b   : > { %v645_v0 = vsel %vm430_vm2, %v642_v59, %v644_v54 }
 0x14c   : > { %v647_v2 = vadd.f32 %v645_v0, %v634_v53 }
 0x14e   : > { %v771_v4 = vpop.permute.xlu1 %770  ;;  %v650_v6 = vmul.f32 %v649_v38, %v647_v2  ;;  %v654_v7 = vmul.f32 %v653_v21, %v647_v2  ;;  %v658_v8 = vmul.f32 %v657_v18, %v647_v2  ;;  %v662_v11 = vmul.f32 %v661_v41, %v647_v2  ;;  %v769_v12 = vpop.permute.xlu0 %768 }
 0x14f   : > { %v666_v13 = vmul.f32 %v665_v55, %v647_v2  ;;  %v670_v14 = vmul.f32 %v669_v58, %v647_v2  ;;  %v674_v15 = vmul.f32 %v673_v20, %v647_v2  ;;  %v678_v37 = vmul.f32 %v677_v63, %v647_v2 }
 0x150   : > { %v651_v16 = vadd.f32 %v650_v6, %v511_v61  ;;  %v655_v22 = vadd.f32 %v654_v7, %v515_v1  ;;  %v659_v23 = vadd.f32 %v658_v8, %v519_v52  ;;  %v663_v9 = vadd.f32 %v662_v11, %v523_v43 }
 0x151   : > { %v667_v10 = vadd.f32 %v666_v13, %v527_v3  ;;  %v671_v24 = vadd.f32 %v670_v14, %v531_v56  ;;  %v675_v5 = vadd.f32 %v674_v15, %v535_v57  ;;  %v679_v25 = vadd.f32 %v678_v37, %v539_v34 }
 0x152   : > { %v784_v26 = vpop.permute.xlu1 %783  ;;  %v772_v27 = vsel %vm416_vm3, %v769_v12, %v771_v4  ;;  %v782_v28 = vpop.permute.xlu0 %781  ;;  %v817_v38 = vstv %s2083_s12  ;;  %v929_v1 = vstv %s2089_s10  ;;  %v933_v52 = vstv %s2091_s15 }
 0x153   : > { %v774_v46 = vadd.f32 %v772_v27, %v2002_v51  ;;  %v785_v31 = vsel %vm430_vm2, %v782_v28, %v784_v26  ;;  %v937_v43 = vstv %s2097_s7  ;;  %v941_v2 = vstv %s2099_s2 }
 0x154   : > { %v945_v3 = vstv %s2104_s8  ;;  %v949_v56 = vstv %s2106_s0  ;;  %v953_v57 = vstv %s2108_s16  ;;  %v957_v34 = vstv %s2110_s1 }
 0x155   : > { %v787_v21 = vadd.f32 %v785_v31, %v774_v46 }
 0x156   : > { %v911_v51 = vpop.permute.xlu1 %910  ;;  %v909_v18 = vpop.permute.xlu0 %908 }
 0x157   : > { %v790_v39 = vmul.f32 %v789_v30, %v787_v21  ;;  %v794_v40 = vmul.f32 %v793_v32, %v787_v21  ;;  %v798_v35 = vmul.f32 %v797_v17, %v787_v21  ;;  %v802_v41 = vmul.f32 %v801_v19, %v787_v21 }
 0x158   : > { %v806_v42 = vmul.f32 %v805_v33, %v787_v21  ;;  %v810_v44 = vmul.f32 %v809_v29, %v787_v21  ;;  %v814_v45 = vmul.f32 %v813_v36, %v787_v21  ;;  %v818_v62 = vmul.f32 %v817_v38, %v787_v21 }
 0x159   : > { %v791_v47 = vadd.f32 %v790_v39, %v651_v16  ;;  %v795_v48 = vadd.f32 %v794_v40, %v655_v22  ;;  %v799_v49 = vadd.f32 %v798_v35, %v659_v23  ;;  %v803_v50 = vadd.f32 %v802_v41, %v663_v9 }
 0x15a   : > { %v924_v54 = vpop.permute.xlu1 %923  ;;  %v807_v53 = vadd.f32 %v806_v42, %v667_v10  ;;  %v811_v55 = vadd.f32 %v810_v44, %v671_v24  ;;  %v815_v58 = vadd.f32 %v814_v45, %v675_v5  ;;  %v819_v59 = vadd.f32 %v818_v62, %v679_v25  ;;  %v922_v61 = vpop.permute.xlu0 %921 }
 0x15b   : > { %v912_v20 = vsel %vm416_vm3, %v909_v18, %v911_v51  ;;  %v925_v63 = vsel %vm430_vm2, %v922_v61, %v924_v54 }
 0x15c   : > { %v914_v0 = vadd.f32 %v912_v20, %v2068_v60 }
 0x15e   : > { %v927_v4 = vadd.f32 %v925_v63, %v914_v0 }
 0x160   : > { %v930_v6 = vmul.f32 %v929_v1, %v927_v4  ;;  %v934_v7 = vmul.f32 %v933_v52, %v927_v4  ;;  %v938_v8 = vmul.f32 %v937_v43, %v927_v4  ;;  %v942_v11 = vmul.f32 %v941_v2, %v927_v4 }
 0x161   : > { %v946_v12 = vmul.f32 %v945_v3, %v927_v4  ;;  %v950_v13 = vmul.f32 %v949_v56, %v927_v4  ;;  %v954_v14 = vmul.f32 %v953_v57, %v927_v4  ;;  %v958_v15 = vmul.f32 %v957_v34, %v927_v4  ;;  %981 = sbr.rel (!%p2196_p3) target bundleno = 368 (0x170), region = 102 }
 0x162   : > { %v931_v37 = vadd.f32 %v930_v6, %v791_v47  ;;  %v935_v60 = vadd.f32 %v934_v7, %v795_v48  ;;  %v939_v16 = vadd.f32 %v938_v8, %v799_v49  ;;  %v943_v22 = vadd.f32 %v942_v11, %v803_v50 }
 0x163   : > { %v947_v23 = vadd.f32 %v946_v12, %v807_v53  ;;  %v951_v9 = vadd.f32 %v950_v13, %v811_v55  ;;  %v955_v10 = vadd.f32 %v954_v14, %v815_v58  ;;  %v959_v24 = vadd.f32 %v958_v15, %v819_v59 }
 0x164   : > { %960 = vst [vmem:[%s376_s18] sm:$0xff] %v931_v37  ;;  %1278 = vst [vmem:[%s376_s18 + $0x8] sm:$0xff] %v935_v60 }
 0x165   : > { %1279 = vst [vmem:[%s376_s18 + $0x10] sm:$0xff] %v939_v16  ;;  %1280 = vst [vmem:[%s376_s18 + $0x18] sm:$0xff] %v943_v22 }
 0x166   : > { %1281 = vst [vmem:[%s376_s18 + $0x20] sm:$0xff] %v947_v23  ;;  %1282 = vst [vmem:[%s376_s18 + $0x28] sm:$0xff] %v951_v9 }
 0x167   : > { %1283 = vst [vmem:[%s376_s18 + $0x30] sm:$0xff] %v955_v10  ;;  %1284 = vst [vmem:[%s376_s18 + $0x38] sm:$0xff] %v959_v24 }
 0x16b   : > { %v1027_v5 = vld [vmem:[%s376_s18] sm:$0xff]  ;;  %v1029_v25 = vld [vmem:[%s376_s18 + $0x8] sm:$0xff] }
 0x16c   : > { %v1031_v26 = vld [vmem:[%s376_s18 + $0x10] sm:$0xff]  ;;  %v1033_v27 = vld [vmem:[%s376_s18 + $0x18] sm:$0xff]  ;;  %1028 = vst [vmem:[%s985_s29] sm:$0xff] %v1027_v5  ;;  %1030 = vst [vmem:[%s985_s29 + $0x10] sm:$0xff] %v1029_v25 }
 0x16d   : > { %v1035_v28 = vld [vmem:[%s376_s18 + $0x20] sm:$0xff]  ;;  %v1037_v46 = vld [vmem:[%s376_s18 + $0x28] sm:$0xff]  ;;  %1032 = vst [vmem:[%s985_s29 + $0x20] sm:$0xff] %v1031_v26  ;;  %1034 = vst [vmem:[%s985_s29 + $0x30] sm:$0xff] %v1033_v27 }
 0x16e   : > { %v1039_v30 = vld [vmem:[%s376_s18 + $0x30] sm:$0xff]  ;;  %v1041_v31 = vld [vmem:[%s376_s18 + $0x38] sm:$0xff]  ;;  %1036 = vst [vmem:[%s985_s29 + $0x40] sm:$0xff] %v1035_v28  ;;  %1038 = vst [vmem:[%s985_s29 + $0x50] sm:$0xff] %v1037_v46 }
 0x16f   : > { %1040 = vst [vmem:[%s985_s29 + $0x60] sm:$0xff] %v1039_v30  ;;  %1042 = vst [vmem:[%s985_s29 + $0x70] sm:$0xff] %v1041_v31 }
 0x170 PF: > { %s17_s26 = sadd.s32 1, %s1521_s26   ;;  %s2197_s22 = sld [smem:[#allocation16_spill]] }
 0x171   : > { %p14_p6 = scmp.ge.s32.totalorder %s17_s26, 6   ;;  %s2198_s23 = sld [smem:[#allocation12_spill]] }
 0x172   : > { %s2199_s13 = sld [smem:[#allocation13_spill]]  ;;  %s2200_s24 = sld [smem:[#allocation14_spill]] }
 0x173   : > { %s2201_s25 = sld [smem:[#allocation15_spill]]  ;;  %s2202_s18 = smov %s1493_s19 }
 0x174   : > { %s2203_s19 = smov %s1646_s14  ;;  %s2204_s20 = smov %s1501_s21 }
 0x175   :  { %16 = sbr.rel (!%p14_p6) target bundleno = 12 (0xc), region = 193 }
 0x176   : > { %s2205_s21 = smov %s2197_s22 }
 0x177   : > { %s2206_s22 = smov %s2198_s23 }
 0x178   : > { %s2207_s23 = smov %s2199_s13 }
 0x17c   :  { %1058 = vsyncpa [#allocation3], 1 }
 0x17d   :  { %1060 = vsyncpa [#allocation3 + $0x1], 1 }
 0x17e   :  { %1061 = vsyncpa [#allocation5], 1 }

</bundles_post_ra>
